<compile_context>
chip_gen: v7x
topology: tpu7x:2x2x1
jax: 0.10.0
libtpu: 0.0.40
codegen_flags: <defaults>
</compile_context>

<pallas_src>
import functools
import math

import jax
import jax.numpy as jnp
from jax.experimental import pallas as pl
from jax.experimental.pallas import tpu as pltpu  # noqa: F401  (kept for TPU-specific tuning hooks)


# ------------------------------ fused kernel -------------------------------

def _batch_forward_kernel(
    src_ref, pe_ref, mask_ref,
    emb_w_ref, emb_b_ref,
    wqkv_ref, bqkv_ref, wo_ref, ob_ref,
    ff1_w_ref, ff1_b_ref, ff2_w_ref, ff2_b_ref,
    ln1_g_ref, ln1_b_ref, ln2_g_ref, ln2_b_ref,
    lnf_g_ref, lnf_b_ref,
    fc1_w_ref, fc1_b_ref, bn_s_ref, bn_h_ref, fc2_w_ref, fc2_b_ref,
    out_ref,
    *, batch, seq_len, nhead, num_layers, d_model):
    """Full forward pass for the WHOLE batch in one invocation (no grid)."""
    B, S, H, L, D = batch, seq_len, nhead, num_layers, d_model
    Dh = D // H
    BS = B * S
    scale = 1.0 / math.sqrt(Dh)
    f32, bf16 = jnp.float32, jnp.bfloat16

    def mm(a, w_bf16):
        # bf16 MXU matmul with f32 accumulation.
        return jnp.dot(a.astype(bf16), w_bf16, preferred_element_type=f32)

    def layernorm(v, g, b, eps=1e-5):
        mu = jnp.mean(v, axis=-1, keepdims=True)
        vc = v - mu
        var = jnp.mean(vc * vc, axis=-1, keepdims=True)
        return vc * jax.lax.rsqrt(var + eps) * g + b

    # Block-diagonal (batch, head) additive mask for the packed scores: 0 inside a
    # group, -1e30 across groups.  Precomputed in the wrapper; loaded once.
    neg_mask = mask_ref[...]                                             # [B*H*S, B*H*S]

    # ---- src embedding + positional encoding (Dropout = identity, eval) ----
    x = mm(src_ref[...], emb_w_ref[...]) + emb_b_ref[...] + pe_ref[...]  # [B*S, D] f32

    # ---- post-norm TransformerEncoder layers ----
    for l in range(L):
        # Fused QKV projection: one MXU push per layer.
        qkv = mm(x, wqkv_ref[l]) + bqkv_ref[l]                           # [B*S, 3D] f32
        q = qkv[:, :D] * scale
        k = qkv[:, D:2 * D]
        v = qkv[:, 2 * D:]

        # Pack heads along sublanes: rows ordered (head, batch, seq).
        qp = jnp.concatenate([q[:, h * Dh:(h + 1) * Dh] for h in range(H)],
                             axis=0).astype(bf16)                        # [H*B*S, Dh]
        kp = jnp.concatenate([k[:, h * Dh:(h + 1) * Dh] for h in range(H)],
                             axis=0).astype(bf16)
        vp = jnp.concatenate([v[:, h * Dh:(h + 1) * Dh] for h in range(H)],
                             axis=0).astype(bf16)

        # One scores matmul (contract last dims, no explicit k.T) + block-diag mask.
        s = jax.lax.dot_general(qp, kp, (((1,), (1,)), ((), ())),
                                preferred_element_type=f32) + neg_mask   # [P, P]
        s = s - jnp.max(s, axis=-1, keepdims=True)
        p = jnp.exp(s)
        p = p * pl.reciprocal(jnp.sum(p, axis=-1, keepdims=True), approx=True)

        # One PV matmul, then head-merge by lane concat + one out-projection matmul.
        op = mm(p, vp)                                                   # [H*B*S, Dh]
        om = jnp.concatenate([op[h * BS:(h + 1) * BS, :] for h in range(H)],
                             axis=1)                                     # [B*S, D]
        attn = mm(om, wo_ref[l]) + ob_ref[l]
        x = layernorm(x + attn, ln1_g_ref[l], ln1_b_ref[l])

        hid = jnp.maximum(mm(x, ff1_w_ref[l]) + ff1_b_ref[l], 0.0)
        ff = mm(hid, ff2_w_ref[l]) + ff2_b_ref[l]
        x = layernorm(x + ff, ln2_g_ref[l], ln2_b_ref[l])

    # ---- final encoder LayerNorm + fc head on the last time step of each sequence ----
    last = jnp.concatenate([x[b * S + S - 1: b * S + S, :] for b in range(B)],
                           axis=0)                                       # [B, D]
    last = layernorm(last, lnf_g_ref[...], lnf_b_ref[...])
    hid = jnp.maximum(mm(last, fc1_w_ref[...]) + fc1_b_ref[...], 0.0)
    hid = hid * bn_s_ref[...] + bn_h_ref[...]       # BatchNorm1d folded (eval stats)
    logits = mm(hid, fc2_w_ref[...]) + fc2_b_ref[...]
    out_ref[...] = jax.nn.sigmoid(logits).astype(out_ref.dtype)          # single [B, C] store


def transformer_multilabel_forward(params, src, pe_table, nhead):
    """src: [seq_len, batch, num_bands] (PyTorch seq-first convention)."""
    S, B, nb = src.shape
    D = params["emb_w"].shape[1]
    C = params["fc2_b"].shape[-1]
    L = params["wqkv"].shape[0]

    # Batch-major flattening: row = b * S + s.
    src_flat = jnp.transpose(src, (1, 0, 2)).reshape(B * S, nb)
    pe_bs = jnp.tile(pe_table[:S], (B, 1))                               # [B*S, D]

    # Block-diagonal additive mask over (batch, head) groups of the packed scores.
    P = B * nhead * S
    gid = jnp.arange(P, dtype=jnp.int32) // S
    neg_mask = jnp.where(gid[:, None] == gid[None, :], 0.0, -1e30).astype(jnp.float32)

    args = (src_flat, pe_bs, neg_mask,
            params["emb_w"], params["emb_b"],
            params["wqkv"], params["bqkv"], params["wo"], params["out_b"],
            params["ff1_w"], params["ff1_b"], params["ff2_w"], params["ff2_b"],
            params["ln1_g"], params["ln1_b"], params["ln2_g"], params["ln2_b"],
            params["ln_f_g"], params["ln_f_b"],
            params["fc1_w"], params["fc1_b"],
            params["bn_scale"], params["bn_shift"],
            params["fc2_w"], params["fc2_b"])

    kernel = functools.partial(_batch_forward_kernel,
                               batch=B, seq_len=S, nhead=nhead,
                               num_layers=L, d_model=D)

    # Single invocation, no grid: every input is a whole-array VMEM block,
    # all intermediates live in VMEM / vregs, output is one [B, C] store.
    return pl.pallas_call(
        kernel,
        out_shape=jax.ShapeDtypeStruct((B, C), jnp.float32),
    )(*args)


# ------------------------------ parameter init -----------------------------

def make_positional_encoding(d_model, max_len=5000):
    position = jnp.arange(max_len, dtype=jnp.float32)[:, None]
    div_term = jnp.exp(jnp.arange(0, d_model, 2, dtype=jnp.float32)
                       * (-math.log(10000.0) / d_model))
    pe = jnp.zeros((max_len, d_model), jnp.float32)
    pe = pe.at[:, 0::2].set(jnp.sin(position * div_term))
    pe = pe.at[:, 1::2].set(jnp.cos(position * div_term))
    return pe                                                            # [max_len, D]


def _dense_init(key, fan_in, fan_out):
    kw, kb = jax.random.split(key)
    bound = 1.0 / math.sqrt(fan_in)
    w = jax.random.uniform(kw, (fan_in, fan_out), jnp.float32, -bound, bound)
    b = jax.random.uniform(kb, (fan_out,), jnp.float32, -bound, bound)
    return w, b


def init_params(key, num_bands, num_classes, d_model, nhead, num_layers, dim_ff,
                fc_hidden=256):
    assert d_model % nhead == 0
    keys = jax.random.split(key, 3 + num_layers)
    p = {}

    w, b = _dense_init(keys[0], num_bands, d_model)
    p["emb_w"] = w.astype(jnp.bfloat16)
    p["emb_b"] = b.reshape(1, d_model)

    wqkv, bqkv, wo, ob = [], [], [], []
    f1w, f1b, f2w, f2b = [], [], [], []
    l1g, l1b, l2g, l2b = [], [], [], []
    for l in range(num_layers):
        lk = jax.random.split(keys[1 + l], 4)
        # Packed in-projection [D, 3D] (q | k | v) — lane-dense, fused in-kernel.
        w, b = _dense_init(lk[0], d_model, 3 * d_model)
        wqkv.append(w); bqkv.append(b.reshape(1, 3 * d_model))
        # Out projection kept as a full [D, D] slab (head merge done in-kernel).
        w, b = _dense_init(lk[1], d_model, d_model)
        wo.append(w); ob.append(b.reshape(1, d_model))
        # Feed-forward.
        w, b = _dense_init(lk[2], d_model, dim_ff)
        f1w.append(w); f1b.append(b.reshape(1, dim_ff))
        w, b = _dense_init(lk[3], dim_ff, d_model)
        f2w.append(w); f2b.append(b.reshape(1, d_model))
        # Layer norms.
        l1g.append(jnp.ones((1, d_model), jnp.float32))
        l1b.append(jnp.zeros((1, d_model), jnp.float32))
        l2g.append(jnp.ones((1, d_model), jnp.float32))
        l2b.append(jnp.zeros((1, d_model), jnp.float32))

    p["wqkv"] = jnp.stack(wqkv).astype(jnp.bfloat16)    # [L, D, 3D]
    p["bqkv"] = jnp.stack(bqkv)                         # [L, 1, 3D]
    p["wo"] = jnp.stack(wo).astype(jnp.bfloat16)        # [L, D, D]
    p["out_b"] = jnp.stack(ob)                          # [L, 1, D]
    p["ff1_w"] = jnp.stack(f1w).astype(jnp.bfloat16)    # [L, D, FF]
    p["ff1_b"] = jnp.stack(f1b)
    p["ff2_w"] = jnp.stack(f2w).astype(jnp.bfloat16)    # [L, FF, D]
    p["ff2_b"] = jnp.stack(f2b)
    p["ln1_g"] = jnp.stack(l1g); p["ln1_b"] = jnp.stack(l1b)
    p["ln2_g"] = jnp.stack(l2g); p["ln2_b"] = jnp.stack(l2b)

    p["ln_f_g"] = jnp.ones((1, d_model), jnp.float32)
    p["ln_f_b"] = jnp.zeros((1, d_model), jnp.float32)

    # fc head: Linear(d_model,256) -> ReLU -> BatchNorm1d(eval) -> Dropout -> Linear -> Sigmoid
    w, b = _dense_init(keys[1 + num_layers], d_model, fc_hidden)
    p["fc1_w"] = w.astype(jnp.bfloat16)
    p["fc1_b"] = b.reshape(1, fc_hidden)
    bn_gamma = jnp.ones((fc_hidden,), jnp.float32)
    bn_beta = jnp.zeros((fc_hidden,), jnp.float32)
    bn_mean = jnp.zeros((fc_hidden,), jnp.float32)
    bn_var = jnp.ones((fc_hidden,), jnp.float32)
    bn_scale = bn_gamma / jnp.sqrt(bn_var + 1e-5)
    p["bn_scale"] = bn_scale.reshape(1, fc_hidden)
    p["bn_shift"] = (bn_beta - bn_mean * bn_scale).reshape(1, fc_hidden)
    w, b = _dense_init(keys[2 + num_layers], fc_hidden, num_classes)
    p["fc2_w"] = w.astype(jnp.bfloat16)
    p["fc2_b"] = b.reshape(1, num_classes)
    return p


# ----------------------------------- main -----------------------------------

if __name__ == "__main__":
    seq_len, batch = 8, 2
    num_bands, num_classes = 4, 6
    d_model, nhead, num_layers, dim_feedforward = 32, 4, 2, 64

    key = jax.random.PRNGKey(0)
    k_param, k_data = jax.random.split(key)

    params = init_params(k_param, num_bands, num_classes, d_model, nhead,
                         num_layers, dim_feedforward)
    pe = make_positional_encoding(d_model)

    # src: [seq_len, batch, num_bands]
    src = jax.random.normal(k_data, (seq_len, batch, num_bands), jnp.float32)

    fwd = jax.jit(lambda p, s: transformer_multilabel_forward(p, s, pe, nhead))
    out = jax.block_until_ready(fwd(params, src))

    assert out.shape == (batch, num_classes)
    assert bool(jnp.all(jnp.isfinite(out)))
    assert bool(jnp.all((out >= 0.0) & (out <= 1.0)))   # sigmoid output range
    print("KERNEL_OK")
</pallas_src>

<mosaic_0001>
module attributes {stable_mosaic.version = 11 : i64} {
  func.func @_batch_forward_kernel(%arg0: memref<16x4xf32, #tpu.memory_space<vmem>>, %arg1: memref<16x32xf32, #tpu.memory_space<vmem>>, %arg2: memref<64x64xf32, #tpu.memory_space<vmem>>, %arg3: memref<4x32xbf16, #tpu.memory_space<vmem>>, %arg4: memref<1x32xf32, #tpu.memory_space<vmem>>, %arg5: memref<2x32x96xbf16, #tpu.memory_space<vmem>>, %arg6: memref<2x1x96xf32, #tpu.memory_space<vmem>>, %arg7: memref<2x32x32xbf16, #tpu.memory_space<vmem>>, %arg8: memref<2x1x32xf32, #tpu.memory_space<vmem>>, %arg9: memref<2x32x64xbf16, #tpu.memory_space<vmem>>, %arg10: memref<2x1x64xf32, #tpu.memory_space<vmem>>, %arg11: memref<2x64x32xbf16, #tpu.memory_space<vmem>>, %arg12: memref<2x1x32xf32, #tpu.memory_space<vmem>>, %arg13: memref<2x1x32xf32, #tpu.memory_space<vmem>>, %arg14: memref<2x1x32xf32, #tpu.memory_space<vmem>>, %arg15: memref<2x1x32xf32, #tpu.memory_space<vmem>>, %arg16: memref<2x1x32xf32, #tpu.memory_space<vmem>>, %arg17: memref<1x32xf32, #tpu.memory_space<vmem>>, %arg18: memref<1x32xf32, #tpu.memory_space<vmem>>, %arg19: memref<32x256xbf16, #tpu.memory_space<vmem>>, %arg20: memref<1x256xf32, #tpu.memory_space<vmem>>, %arg21: memref<1x256xf32, #tpu.memory_space<vmem>>, %arg22: memref<1x256xf32, #tpu.memory_space<vmem>>, %arg23: memref<256x6xbf16, #tpu.memory_space<vmem>>, %arg24: memref<1x6xf32, #tpu.memory_space<vmem>>, %arg25: memref<2x6xf32, #tpu.memory_space<vmem>>) attributes {dimension_semantics = [], scalar_prefetch = 0 : i64, scratch_operands = 0 : i64, tpu.core_type = #tpu.core_type<tc>} {
    %c0 = arith.constant 0 : index
    %c0_0 = arith.constant 0 : index
    %0 = vector.load %arg2[%c0, %c0_0] : memref<64x64xf32, #tpu.memory_space<vmem>>, vector<64x64xf32>
    %c0_1 = arith.constant 0 : index
    %c0_2 = arith.constant 0 : index
    %1 = vector.load %arg0[%c0_1, %c0_2] : memref<16x4xf32, #tpu.memory_space<vmem>>, vector<16x4xf32>
    %c0_3 = arith.constant 0 : index
    %c0_4 = arith.constant 0 : index
    %2 = vector.load %arg3[%c0_3, %c0_4] : memref<4x32xbf16, #tpu.memory_space<vmem>>, vector<4x32xbf16>
    %3 = arith.truncf %1 : vector<16x4xf32> to vector<16x4xbf16>
    %cst = arith.constant dense<0.000000e+00> : vector<16x32xf32>
    %4 = tpu.matmul %3, %2, %cst {dimension_numbers = #tpu.dot_dimension_numbers<[1], [0], [0], [1], [0, 0, 1, 1], [], []>} : vector<16x4xbf16>, vector<4x32xbf16>, vector<16x32xf32> -> vector<16x32xf32>
    %c0_5 = arith.constant 0 : index
    %c0_6 = arith.constant 0 : index
    %5 = vector.load %arg4[%c0_5, %c0_6] : memref<1x32xf32, #tpu.memory_space<vmem>>, vector<1x32xf32>
    %6 = vector.broadcast %5 : vector<1x32xf32> to vector<16x32xf32>
    %7 = arith.addf %4, %6 : vector<16x32xf32>
    %c0_7 = arith.constant 0 : index
    %c0_8 = arith.constant 0 : index
    %8 = vector.load %arg1[%c0_7, %c0_8] : memref<16x32xf32, #tpu.memory_space<vmem>>, vector<16x32xf32>
    %9 = arith.addf %7, %8 : vector<16x32xf32>
    %c0_9 = arith.constant 0 : index
    %c0_10 = arith.constant 0 : index
    %c0_11 = arith.constant 0 : index
    %10 = vector.load %arg5[%c0_9, %c0_10, %c0_11] : memref<2x32x96xbf16, #tpu.memory_space<vmem>>, vector<1x32x96xbf16>
    %11 = vector.shape_cast %10 : vector<1x32x96xbf16> to vector<32x96xbf16>
    %12 = arith.truncf %9 : vector<16x32xf32> to vector<16x32xbf16>
    %cst_12 = arith.constant dense<0.000000e+00> : vector<16x96xf32>
    %13 = tpu.matmul %12, %11, %cst_12 {dimension_numbers = #tpu.dot_dimension_numbers<[1], [0], [0], [1], [0, 0, 1, 1], [], []>} : vector<16x32xbf16>, vector<32x96xbf16>, vector<16x96xf32> -> vector<16x96xf32>
    %c0_13 = arith.constant 0 : index
    %c0_14 = arith.constant 0 : index
    %c0_15 = arith.constant 0 : index
    %14 = vector.load %arg6[%c0_13, %c0_14, %c0_15] : memref<2x1x96xf32, #tpu.memory_space<vmem>>, vector<1x1x96xf32>
    %15 = vector.shape_cast %14 : vector<1x1x96xf32> to vector<1x96xf32>
    %16 = vector.broadcast %15 : vector<1x96xf32> to vector<16x96xf32>
    %17 = arith.addf %13, %16 : vector<16x96xf32>
    %18 = vector.extract_strided_slice %17 {offsets = [0, 0], sizes = [16, 32], strides = [1, 1]} : vector<16x96xf32> to vector<16x32xf32>
    %cst_16 = arith.constant 0.353553385 : f32
    %19 = vector.broadcast %cst_16 : f32 to vector<16x32xf32>
    %20 = arith.mulf %18, %19 : vector<16x32xf32>
    %21 = vector.extract_strided_slice %17 {offsets = [0, 32], sizes = [16, 32], strides = [1, 1]} : vector<16x96xf32> to vector<16x32xf32>
    %22 = vector.extract_strided_slice %17 {offsets = [0, 64], sizes = [16, 32], strides = [1, 1]} : vector<16x96xf32> to vector<16x32xf32>
    %23 = vector.extract_strided_slice %20 {offsets = [0, 0], sizes = [16, 8], strides = [1, 1]} : vector<16x32xf32> to vector<16x8xf32>
    %24 = vector.extract_strided_slice %20 {offsets = [0, 8], sizes = [16, 8], strides = [1, 1]} : vector<16x32xf32> to vector<16x8xf32>
    %25 = vector.extract_strided_slice %20 {offsets = [0, 16], sizes = [16, 8], strides = [1, 1]} : vector<16x32xf32> to vector<16x8xf32>
    %26 = vector.extract_strided_slice %20 {offsets = [0, 24], sizes = [16, 8], strides = [1, 1]} : vector<16x32xf32> to vector<16x8xf32>
    %27 = tpu.concatenate %23, %24, %25, %26 in 0 : vector<16x8xf32>, vector<16x8xf32>, vector<16x8xf32>, vector<16x8xf32> -> vector<64x8xf32>
    %28 = arith.truncf %27 : vector<64x8xf32> to vector<64x8xbf16>
    %29 = vector.extract_strided_slice %21 {offsets = [0, 0], sizes = [16, 8], strides = [1, 1]} : vector<16x32xf32> to vector<16x8xf32>
    %30 = vector.extract_strided_slice %21 {offsets = [0, 8], sizes = [16, 8], strides = [1, 1]} : vector<16x32xf32> to vector<16x8xf32>
    %31 = vector.extract_strided_slice %21 {offsets = [0, 16], sizes = [16, 8], strides = [1, 1]} : vector<16x32xf32> to vector<16x8xf32>
    %32 = vector.extract_strided_slice %21 {offsets = [0, 24], sizes = [16, 8], strides = [1, 1]} : vector<16x32xf32> to vector<16x8xf32>
    %33 = tpu.concatenate %29, %30, %31, %32 in 0 : vector<16x8xf32>, vector<16x8xf32>, vector<16x8xf32>, vector<16x8xf32> -> vector<64x8xf32>
    %34 = arith.truncf %33 : vector<64x8xf32> to vector<64x8xbf16>
    %35 = vector.extract_strided_slice %22 {offsets = [0, 0], sizes = [16, 8], strides = [1, 1]} : vector<16x32xf32> to vector<16x8xf32>
    %36 = vector.extract_strided_slice %22 {offsets = [0, 8], sizes = [16, 8], strides = [1, 1]} : vector<16x32xf32> to vector<16x8xf32>
    %37 = vector.extract_strided_slice %22 {offsets = [0, 16], sizes = [16, 8], strides = [1, 1]} : vector<16x32xf32> to vector<16x8xf32>
    %38 = vector.extract_strided_slice %22 {offsets = [0, 24], sizes = [16, 8], strides = [1, 1]} : vector<16x32xf32> to vector<16x8xf32>
    %39 = tpu.concatenate %35, %36, %37, %38 in 0 : vector<16x8xf32>, vector<16x8xf32>, vector<16x8xf32>, vector<16x8xf32> -> vector<64x8xf32>
    %40 = arith.truncf %39 : vector<64x8xf32> to vector<64x8xbf16>
    %cst_17 = arith.constant dense<0.000000e+00> : vector<64x64xf32>
    %41 = tpu.matmul %28, %34, %cst_17 {dimension_numbers = #tpu.dot_dimension_numbers<[1], [1], [0], [0], [0, 0, 1, 0], [], []>} : vector<64x8xbf16>, vector<64x8xbf16>, vector<64x64xf32> -> vector<64x64xf32>
    %42 = arith.addf %41, %0 : vector<64x64xf32>
    %cst_18 = arith.constant dense<0xFF800000> : vector<64xf32>
    %43 = vector.multi_reduction <maximumf>, %42, %cst_18 [1] : vector<64x64xf32> to vector<64xf32>
    %44 = vector.shape_cast %43 : vector<64xf32> to vector<64x1xf32>
    %45 = vector.broadcast %44 : vector<64x1xf32> to vector<64x64xf32>
    %46 = arith.subf %42, %45 : vector<64x64xf32>
    %47 = math.exp %46 : vector<64x64xf32>
    %cst_19 = arith.constant dense<0.000000e+00> : vector<64xf32>
    %48 = vector.multi_reduction <add>, %47, %cst_19 [1] : vector<64x64xf32> to vector<64xf32>
    %49 = vector.shape_cast %48 : vector<64xf32> to vector<64x1xf32>
    %50 = tpu.reciprocal %49 {approx = true} : vector<64x1xf32> -> vector<64x1xf32>
    %51 = vector.broadcast %50 : vector<64x1xf32> to vector<64x64xf32>
    %52 = arith.mulf %47, %51 : vector<64x64xf32>
    %53 = arith.truncf %52 : vector<64x64xf32> to vector<64x64xbf16>
    %cst_20 = arith.constant dense<0.000000e+00> : vector<64x8xf32>
    %54 = tpu.matmul %53, %40, %cst_20 {dimension_numbers = #tpu.dot_dimension_numbers<[1], [0], [0], [1], [0, 0, 1, 1], [], []>} : vector<64x64xbf16>, vector<64x8xbf16>, vector<64x8xf32> -> vector<64x8xf32>
    %55 = vector.extract_strided_slice %54 {offsets = [0, 0], sizes = [16, 8], strides = [1, 1]} : vector<64x8xf32> to vector<16x8xf32>
    %56 = vector.extract_strided_slice %54 {offsets = [16, 0], sizes = [16, 8], strides = [1, 1]} : vector<64x8xf32> to vector<16x8xf32>
    %57 = vector.extract_strided_slice %54 {offsets = [32, 0], sizes = [16, 8], strides = [1, 1]} : vector<64x8xf32> to vector<16x8xf32>
    %58 = vector.extract_strided_slice %54 {offsets = [48, 0], sizes = [16, 8], strides = [1, 1]} : vector<64x8xf32> to vector<16x8xf32>
    %59 = tpu.concatenate %55, %56, %57, %58 in 1 : vector<16x8xf32>, vector<16x8xf32>, vector<16x8xf32>, vector<16x8xf32> -> vector<16x32xf32>
    %c0_21 = arith.constant 0 : index
    %c0_22 = arith.constant 0 : index
    %c0_23 = arith.constant 0 : index
    %60 = vector.load %arg7[%c0_21, %c0_22, %c0_23] : memref<2x32x32xbf16, #tpu.memory_space<vmem>>, vector<1x32x32xbf16>
    %61 = vector.shape_cast %60 : vector<1x32x32xbf16> to vector<32x32xbf16>
    %62 = arith.truncf %59 : vector<16x32xf32> to vector<16x32xbf16>
    %cst_24 = arith.constant dense<0.000000e+00> : vector<16x32xf32>
    %63 = tpu.matmul %62, %61, %cst_24 {dimension_numbers = #tpu.dot_dimension_numbers<[1], [0], [0], [1], [0, 0, 1, 1], [], []>} : vector<16x32xbf16>, vector<32x32xbf16>, vector<16x32xf32> -> vector<16x32xf32>
    %c0_25 = arith.constant 0 : index
    %c0_26 = arith.constant 0 : index
    %c0_27 = arith.constant 0 : index
    %64 = vector.load %arg8[%c0_25, %c0_26, %c0_27] : memref<2x1x32xf32, #tpu.memory_space<vmem>>, vector<1x1x32xf32>
    %65 = vector.shape_cast %64 : vector<1x1x32xf32> to vector<1x32xf32>
    %66 = vector.broadcast %65 : vector<1x32xf32> to vector<16x32xf32>
    %67 = arith.addf %63, %66 : vector<16x32xf32>
    %68 = arith.addf %9, %67 : vector<16x32xf32>
    %c0_28 = arith.constant 0 : index
    %c0_29 = arith.constant 0 : index
    %c0_30 = arith.constant 0 : index
    %69 = vector.load %arg13[%c0_28, %c0_29, %c0_30] : memref<2x1x32xf32, #tpu.memory_space<vmem>>, vector<1x1x32xf32>
    %70 = vector.shape_cast %69 : vector<1x1x32xf32> to vector<1x32xf32>
    %c0_31 = arith.constant 0 : index
    %c0_32 = arith.constant 0 : index
    %c0_33 = arith.constant 0 : index
    %71 = vector.load %arg14[%c0_31, %c0_32, %c0_33] : memref<2x1x32xf32, #tpu.memory_space<vmem>>, vector<1x1x32xf32>
    %72 = vector.shape_cast %71 : vector<1x1x32xf32> to vector<1x32xf32>
    %cst_34 = arith.constant dense<0.000000e+00> : vector<16xf32>
    %73 = vector.multi_reduction <add>, %68, %cst_34 [1] : vector<16x32xf32> to vector<16xf32>
    %74 = vector.shape_cast %73 : vector<16xf32> to vector<16x1xf32>
    %cst_35 = arith.constant 3.200000e+01 : f32
    %75 = vector.broadcast %cst_35 : f32 to vector<16x1xf32>
    %76 = arith.divf %74, %75 : vector<16x1xf32>
    %77 = vector.broadcast %76 : vector<16x1xf32> to vector<16x32xf32>
    %78 = arith.subf %68, %77 : vector<16x32xf32>
    %79 = arith.mulf %78, %78 : vector<16x32xf32>
    %cst_36 = arith.constant dense<0.000000e+00> : vector<16xf32>
    %80 = vector.multi_reduction <add>, %79, %cst_36 [1] : vector<16x32xf32> to vector<16xf32>
    %81 = vector.shape_cast %80 : vector<16xf32> to vector<16x1xf32>
    %cst_37 = arith.constant 3.200000e+01 : f32
    %82 = vector.broadcast %cst_37 : f32 to vector<16x1xf32>
    %83 = arith.divf %81, %82 : vector<16x1xf32>
    %cst_38 = arith.constant 9.99999974E-6 : f32
    %84 = vector.broadcast %cst_38 : f32 to vector<16x1xf32>
    %85 = arith.addf %83, %84 : vector<16x1xf32>
    %86 = math.rsqrt %85 : vector<16x1xf32>
    %87 = vector.broadcast %86 : vector<16x1xf32> to vector<16x32xf32>
    %88 = arith.mulf %78, %87 : vector<16x32xf32>
    %89 = vector.broadcast %70 : vector<1x32xf32> to vector<16x32xf32>
    %90 = arith.mulf %88, %89 : vector<16x32xf32>
    %91 = vector.broadcast %72 : vector<1x32xf32> to vector<16x32xf32>
    %92 = arith.addf %90, %91 : vector<16x32xf32>
    %c0_39 = arith.constant 0 : index
    %c0_40 = arith.constant 0 : index
    %c0_41 = arith.constant 0 : index
    %93 = vector.load %arg9[%c0_39, %c0_40, %c0_41] : memref<2x32x64xbf16, #tpu.memory_space<vmem>>, vector<1x32x64xbf16>
    %94 = vector.shape_cast %93 : vector<1x32x64xbf16> to vector<32x64xbf16>
    %95 = arith.truncf %92 : vector<16x32xf32> to vector<16x32xbf16>
    %cst_42 = arith.constant dense<0.000000e+00> : vector<16x64xf32>
    %96 = tpu.matmul %95, %94, %cst_42 {dimension_numbers = #tpu.dot_dimension_numbers<[1], [0], [0], [1], [0, 0, 1, 1], [], []>} : vector<16x32xbf16>, vector<32x64xbf16>, vector<16x64xf32> -> vector<16x64xf32>
    %c0_43 = arith.constant 0 : index
    %c0_44 = arith.constant 0 : index
    %c0_45 = arith.constant 0 : index
    %97 = vector.load %arg10[%c0_43, %c0_44, %c0_45] : memref<2x1x64xf32, #tpu.memory_space<vmem>>, vector<1x1x64xf32>
    %98 = vector.shape_cast %97 : vector<1x1x64xf32> to vector<1x64xf32>
    %99 = vector.broadcast %98 : vector<1x64xf32> to vector<16x64xf32>
    %100 = arith.addf %96, %99 : vector<16x64xf32>
    %cst_46 = arith.constant 0.000000e+00 : f32
    %101 = vector.broadcast %cst_46 : f32 to vector<16x64xf32>
    %102 = arith.maximumf %100, %101 : vector<16x64xf32>
    %c0_47 = arith.constant 0 : index
    %c0_48 = arith.constant 0 : index
    %c0_49 = arith.constant 0 : index
    %103 = vector.load %arg11[%c0_47, %c0_48, %c0_49] : memref<2x64x32xbf16, #tpu.memory_space<vmem>>, vector<1x64x32xbf16>
    %104 = vector.shape_cast %103 : vector<1x64x32xbf16> to vector<64x32xbf16>
    %105 = arith.truncf %102 : vector<16x64xf32> to vector<16x64xbf16>
    %cst_50 = arith.constant dense<0.000000e+00> : vector<16x32xf32>
    %106 = tpu.matmul %105, %104, %cst_50 {dimension_numbers = #tpu.dot_dimension_numbers<[1], [0], [0], [1], [0, 0, 1, 1], [], []>} : vector<16x64xbf16>, vector<64x32xbf16>, vector<16x32xf32> -> vector<16x32xf32>
    %c0_51 = arith.constant 0 : index
    %c0_52 = arith.constant 0 : index
    %c0_53 = arith.constant 0 : index
    %107 = vector.load %arg12[%c0_51, %c0_52, %c0_53] : memref<2x1x32xf32, #tpu.memory_space<vmem>>, vector<1x1x32xf32>
    %108 = vector.shape_cast %107 : vector<1x1x32xf32> to vector<1x32xf32>
    %109 = vector.broadcast %108 : vector<1x32xf32> to vector<16x32xf32>
    %110 = arith.addf %106, %109 : vector<16x32xf32>
    %111 = arith.addf %92, %110 : vector<16x32xf32>
    %c0_54 = arith.constant 0 : index
    %c0_55 = arith.constant 0 : index
    %c0_56 = arith.constant 0 : index
    %112 = vector.load %arg15[%c0_54, %c0_55, %c0_56] : memref<2x1x32xf32, #tpu.memory_space<vmem>>, vector<1x1x32xf32>
    %113 = vector.shape_cast %112 : vector<1x1x32xf32> to vector<1x32xf32>
    %c0_57 = arith.constant 0 : index
    %c0_58 = arith.constant 0 : index
    %c0_59 = arith.constant 0 : index
    %114 = vector.load %arg16[%c0_57, %c0_58, %c0_59] : memref<2x1x32xf32, #tpu.memory_space<vmem>>, vector<1x1x32xf32>
    %115 = vector.shape_cast %114 : vector<1x1x32xf32> to vector<1x32xf32>
    %cst_60 = arith.constant dense<0.000000e+00> : vector<16xf32>
    %116 = vector.multi_reduction <add>, %111, %cst_60 [1] : vector<16x32xf32> to vector<16xf32>
    %117 = vector.shape_cast %116 : vector<16xf32> to vector<16x1xf32>
    %cst_61 = arith.constant 3.200000e+01 : f32
    %118 = vector.broadcast %cst_61 : f32 to vector<16x1xf32>
    %119 = arith.divf %117, %118 : vector<16x1xf32>
    %120 = vector.broadcast %119 : vector<16x1xf32> to vector<16x32xf32>
    %121 = arith.subf %111, %120 : vector<16x32xf32>
    %122 = arith.mulf %121, %121 : vector<16x32xf32>
    %cst_62 = arith.constant dense<0.000000e+00> : vector<16xf32>
    %123 = vector.multi_reduction <add>, %122, %cst_62 [1] : vector<16x32xf32> to vector<16xf32>
    %124 = vector.shape_cast %123 : vector<16xf32> to vector<16x1xf32>
    %cst_63 = arith.constant 3.200000e+01 : f32
    %125 = vector.broadcast %cst_63 : f32 to vector<16x1xf32>
    %126 = arith.divf %124, %125 : vector<16x1xf32>
    %cst_64 = arith.constant 9.99999974E-6 : f32
    %127 = vector.broadcast %cst_64 : f32 to vector<16x1xf32>
    %128 = arith.addf %126, %127 : vector<16x1xf32>
    %129 = math.rsqrt %128 : vector<16x1xf32>
    %130 = vector.broadcast %129 : vector<16x1xf32> to vector<16x32xf32>
    %131 = arith.mulf %121, %130 : vector<16x32xf32>
    %132 = vector.broadcast %113 : vector<1x32xf32> to vector<16x32xf32>
    %133 = arith.mulf %131, %132 : vector<16x32xf32>
    %134 = vector.broadcast %115 : vector<1x32xf32> to vector<16x32xf32>
    %135 = arith.addf %133, %134 : vector<16x32xf32>
    %c1 = arith.constant 1 : index
    %c0_65 = arith.constant 0 : index
    %c0_66 = arith.constant 0 : index
    %136 = vector.load %arg5[%c1, %c0_65, %c0_66] : memref<2x32x96xbf16, #tpu.memory_space<vmem>>, vector<1x32x96xbf16>
    %137 = vector.shape_cast %136 : vector<1x32x96xbf16> to vector<32x96xbf16>
    %138 = arith.truncf %135 : vector<16x32xf32> to vector<16x32xbf16>
    %cst_67 = arith.constant dense<0.000000e+00> : vector<16x96xf32>
    %139 = tpu.matmul %138, %137, %cst_67 {dimension_numbers = #tpu.dot_dimension_numbers<[1], [0], [0], [1], [0, 0, 1, 1], [], []>} : vector<16x32xbf16>, vector<32x96xbf16>, vector<16x96xf32> -> vector<16x96xf32>
    %c1_68 = arith.constant 1 : index
    %c0_69 = arith.constant 0 : index
    %c0_70 = arith.constant 0 : index
    %140 = vector.load %arg6[%c1_68, %c0_69, %c0_70] : memref<2x1x96xf32, #tpu.memory_space<vmem>>, vector<1x1x96xf32>
    %141 = vector.shape_cast %140 : vector<1x1x96xf32> to vector<1x96xf32>
    %142 = vector.broadcast %141 : vector<1x96xf32> to vector<16x96xf32>
    %143 = arith.addf %139, %142 : vector<16x96xf32>
    %144 = vector.extract_strided_slice %143 {offsets = [0, 0], sizes = [16, 32], strides = [1, 1]} : vector<16x96xf32> to vector<16x32xf32>
    %cst_71 = arith.constant 0.353553385 : f32
    %145 = vector.broadcast %cst_71 : f32 to vector<16x32xf32>
    %146 = arith.mulf %144, %145 : vector<16x32xf32>
    %147 = vector.extract_strided_slice %143 {offsets = [0, 32], sizes = [16, 32], strides = [1, 1]} : vector<16x96xf32> to vector<16x32xf32>
    %148 = vector.extract_strided_slice %143 {offsets = [0, 64], sizes = [16, 32], strides = [1, 1]} : vector<16x96xf32> to vector<16x32xf32>
    %149 = vector.extract_strided_slice %146 {offsets = [0, 0], sizes = [16, 8], strides = [1, 1]} : vector<16x32xf32> to vector<16x8xf32>
    %150 = vector.extract_strided_slice %146 {offsets = [0, 8], sizes = [16, 8], strides = [1, 1]} : vector<16x32xf32> to vector<16x8xf32>
    %151 = vector.extract_strided_slice %146 {offsets = [0, 16], sizes = [16, 8], strides = [1, 1]} : vector<16x32xf32> to vector<16x8xf32>
    %152 = vector.extract_strided_slice %146 {offsets = [0, 24], sizes = [16, 8], strides = [1, 1]} : vector<16x32xf32> to vector<16x8xf32>
    %153 = tpu.concatenate %149, %150, %151, %152 in 0 : vector<16x8xf32>, vector<16x8xf32>, vector<16x8xf32>, vector<16x8xf32> -> vector<64x8xf32>
    %154 = arith.truncf %153 : vector<64x8xf32> to vector<64x8xbf16>
    %155 = vector.extract_strided_slice %147 {offsets = [0, 0], sizes = [16, 8], strides = [1, 1]} : vector<16x32xf32> to vector<16x8xf32>
    %156 = vector.extract_strided_slice %147 {offsets = [0, 8], sizes = [16, 8], strides = [1, 1]} : vector<16x32xf32> to vector<16x8xf32>
    %157 = vector.extract_strided_slice %147 {offsets = [0, 16], sizes = [16, 8], strides = [1, 1]} : vector<16x32xf32> to vector<16x8xf32>
    %158 = vector.extract_strided_slice %147 {offsets = [0, 24], sizes = [16, 8], strides = [1, 1]} : vector<16x32xf32> to vector<16x8xf32>
    %159 = tpu.concatenate %155, %156, %157, %158 in 0 : vector<16x8xf32>, vector<16x8xf32>, vector<16x8xf32>, vector<16x8xf32> -> vector<64x8xf32>
    %160 = arith.truncf %159 : vector<64x8xf32> to vector<64x8xbf16>
    %161 = vector.extract_strided_slice %148 {offsets = [0, 0], sizes = [16, 8], strides = [1, 1]} : vector<16x32xf32> to vector<16x8xf32>
    %162 = vector.extract_strided_slice %148 {offsets = [0, 8], sizes = [16, 8], strides = [1, 1]} : vector<16x32xf32> to vector<16x8xf32>
    %163 = vector.extract_strided_slice %148 {offsets = [0, 16], sizes = [16, 8], strides = [1, 1]} : vector<16x32xf32> to vector<16x8xf32>
    %164 = vector.extract_strided_slice %148 {offsets = [0, 24], sizes = [16, 8], strides = [1, 1]} : vector<16x32xf32> to vector<16x8xf32>
    %165 = tpu.concatenate %161, %162, %163, %164 in 0 : vector<16x8xf32>, vector<16x8xf32>, vector<16x8xf32>, vector<16x8xf32> -> vector<64x8xf32>
    %166 = arith.truncf %165 : vector<64x8xf32> to vector<64x8xbf16>
    %cst_72 = arith.constant dense<0.000000e+00> : vector<64x64xf32>
    %167 = tpu.matmul %154, %160, %cst_72 {dimension_numbers = #tpu.dot_dimension_numbers<[1], [1], [0], [0], [0, 0, 1, 0], [], []>} : vector<64x8xbf16>, vector<64x8xbf16>, vector<64x64xf32> -> vector<64x64xf32>
    %168 = arith.addf %167, %0 : vector<64x64xf32>
    %cst_73 = arith.constant dense<0xFF800000> : vector<64xf32>
    %169 = vector.multi_reduction <maximumf>, %168, %cst_73 [1] : vector<64x64xf32> to vector<64xf32>
    %170 = vector.shape_cast %169 : vector<64xf32> to vector<64x1xf32>
    %171 = vector.broadcast %170 : vector<64x1xf32> to vector<64x64xf32>
    %172 = arith.subf %168, %171 : vector<64x64xf32>
    %173 = math.exp %172 : vector<64x64xf32>
    %cst_74 = arith.constant dense<0.000000e+00> : vector<64xf32>
    %174 = vector.multi_reduction <add>, %173, %cst_74 [1] : vector<64x64xf32> to vector<64xf32>
    %175 = vector.shape_cast %174 : vector<64xf32> to vector<64x1xf32>
    %176 = tpu.reciprocal %175 {approx = true} : vector<64x1xf32> -> vector<64x1xf32>
    %177 = vector.broadcast %176 : vector<64x1xf32> to vector<64x64xf32>
    %178 = arith.mulf %173, %177 : vector<64x64xf32>
    %179 = arith.truncf %178 : vector<64x64xf32> to vector<64x64xbf16>
    %cst_75 = arith.constant dense<0.000000e+00> : vector<64x8xf32>
    %180 = tpu.matmul %179, %166, %cst_75 {dimension_numbers = #tpu.dot_dimension_numbers<[1], [0], [0], [1], [0, 0, 1, 1], [], []>} : vector<64x64xbf16>, vector<64x8xbf16>, vector<64x8xf32> -> vector<64x8xf32>
    %181 = vector.extract_strided_slice %180 {offsets = [0, 0], sizes = [16, 8], strides = [1, 1]} : vector<64x8xf32> to vector<16x8xf32>
    %182 = vector.extract_strided_slice %180 {offsets = [16, 0], sizes = [16, 8], strides = [1, 1]} : vector<64x8xf32> to vector<16x8xf32>
    %183 = vector.extract_strided_slice %180 {offsets = [32, 0], sizes = [16, 8], strides = [1, 1]} : vector<64x8xf32> to vector<16x8xf32>
    %184 = vector.extract_strided_slice %180 {offsets = [48, 0], sizes = [16, 8], strides = [1, 1]} : vector<64x8xf32> to vector<16x8xf32>
    %185 = tpu.concatenate %181, %182, %183, %184 in 1 : vector<16x8xf32>, vector<16x8xf32>, vector<16x8xf32>, vector<16x8xf32> -> vector<16x32xf32>
    %c1_76 = arith.constant 1 : index
    %c0_77 = arith.constant 0 : index
    %c0_78 = arith.constant 0 : index
    %186 = vector.load %arg7[%c1_76, %c0_77, %c0_78] : memref<2x32x32xbf16, #tpu.memory_space<vmem>>, vector<1x32x32xbf16>
    %187 = vector.shape_cast %186 : vector<1x32x32xbf16> to vector<32x32xbf16>
    %188 = arith.truncf %185 : vector<16x32xf32> to vector<16x32xbf16>
    %cst_79 = arith.constant dense<0.000000e+00> : vector<16x32xf32>
    %189 = tpu.matmul %188, %187, %cst_79 {dimension_numbers = #tpu.dot_dimension_numbers<[1], [0], [0], [1], [0, 0, 1, 1], [], []>} : vector<16x32xbf16>, vector<32x32xbf16>, vector<16x32xf32> -> vector<16x32xf32>
    %c1_80 = arith.constant 1 : index
    %c0_81 = arith.constant 0 : index
    %c0_82 = arith.constant 0 : index
    %190 = vector.load %arg8[%c1_80, %c0_81, %c0_82] : memref<2x1x32xf32, #tpu.memory_space<vmem>>, vector<1x1x32xf32>
    %191 = vector.shape_cast %190 : vector<1x1x32xf32> to vector<1x32xf32>
    %192 = vector.broadcast %191 : vector<1x32xf32> to vector<16x32xf32>
    %193 = arith.addf %189, %192 : vector<16x32xf32>
    %194 = arith.addf %135, %193 : vector<16x32xf32>
    %c1_83 = arith.constant 1 : index
    %c0_84 = arith.constant 0 : index
    %c0_85 = arith.constant 0 : index
    %195 = vector.load %arg13[%c1_83, %c0_84, %c0_85] : memref<2x1x32xf32, #tpu.memory_space<vmem>>, vector<1x1x32xf32>
    %196 = vector.shape_cast %195 : vector<1x1x32xf32> to vector<1x32xf32>
    %c1_86 = arith.constant 1 : index
    %c0_87 = arith.constant 0 : index
    %c0_88 = arith.constant 0 : index
    %197 = vector.load %arg14[%c1_86, %c0_87, %c0_88] : memref<2x1x32xf32, #tpu.memory_space<vmem>>, vector<1x1x32xf32>
    %198 = vector.shape_cast %197 : vector<1x1x32xf32> to vector<1x32xf32>
    %cst_89 = arith.constant dense<0.000000e+00> : vector<16xf32>
    %199 = vector.multi_reduction <add>, %194, %cst_89 [1] : vector<16x32xf32> to vector<16xf32>
    %200 = vector.shape_cast %199 : vector<16xf32> to vector<16x1xf32>
    %cst_90 = arith.constant 3.200000e+01 : f32
    %201 = vector.broadcast %cst_90 : f32 to vector<16x1xf32>
    %202 = arith.divf %200, %201 : vector<16x1xf32>
    %203 = vector.broadcast %202 : vector<16x1xf32> to vector<16x32xf32>
    %204 = arith.subf %194, %203 : vector<16x32xf32>
    %205 = arith.mulf %204, %204 : vector<16x32xf32>
    %cst_91 = arith.constant dense<0.000000e+00> : vector<16xf32>
    %206 = vector.multi_reduction <add>, %205, %cst_91 [1] : vector<16x32xf32> to vector<16xf32>
    %207 = vector.shape_cast %206 : vector<16xf32> to vector<16x1xf32>
    %cst_92 = arith.constant 3.200000e+01 : f32
    %208 = vector.broadcast %cst_92 : f32 to vector<16x1xf32>
    %209 = arith.divf %207, %208 : vector<16x1xf32>
    %cst_93 = arith.constant 9.99999974E-6 : f32
    %210 = vector.broadcast %cst_93 : f32 to vector<16x1xf32>
    %211 = arith.addf %209, %210 : vector<16x1xf32>
    %212 = math.rsqrt %211 : vector<16x1xf32>
    %213 = vector.broadcast %212 : vector<16x1xf32> to vector<16x32xf32>
    %214 = arith.mulf %204, %213 : vector<16x32xf32>
    %215 = vector.broadcast %196 : vector<1x32xf32> to vector<16x32xf32>
    %216 = arith.mulf %214, %215 : vector<16x32xf32>
    %217 = vector.broadcast %198 : vector<1x32xf32> to vector<16x32xf32>
    %218 = arith.addf %216, %217 : vector<16x32xf32>
    %c1_94 = arith.constant 1 : index
    %c0_95 = arith.constant 0 : index
    %c0_96 = arith.constant 0 : index
    %219 = vector.load %arg9[%c1_94, %c0_95, %c0_96] : memref<2x32x64xbf16, #tpu.memory_space<vmem>>, vector<1x32x64xbf16>
    %220 = vector.shape_cast %219 : vector<1x32x64xbf16> to vector<32x64xbf16>
    %221 = arith.truncf %218 : vector<16x32xf32> to vector<16x32xbf16>
    %cst_97 = arith.constant dense<0.000000e+00> : vector<16x64xf32>
    %222 = tpu.matmul %221, %220, %cst_97 {dimension_numbers = #tpu.dot_dimension_numbers<[1], [0], [0], [1], [0, 0, 1, 1], [], []>} : vector<16x32xbf16>, vector<32x64xbf16>, vector<16x64xf32> -> vector<16x64xf32>
    %c1_98 = arith.constant 1 : index
    %c0_99 = arith.constant 0 : index
    %c0_100 = arith.constant 0 : index
    %223 = vector.load %arg10[%c1_98, %c0_99, %c0_100] : memref<2x1x64xf32, #tpu.memory_space<vmem>>, vector<1x1x64xf32>
    %224 = vector.shape_cast %223 : vector<1x1x64xf32> to vector<1x64xf32>
    %225 = vector.broadcast %224 : vector<1x64xf32> to vector<16x64xf32>
    %226 = arith.addf %222, %225 : vector<16x64xf32>
    %cst_101 = arith.constant 0.000000e+00 : f32
    %227 = vector.broadcast %cst_101 : f32 to vector<16x64xf32>
    %228 = arith.maximumf %226, %227 : vector<16x64xf32>
    %c1_102 = arith.constant 1 : index
    %c0_103 = arith.constant 0 : index
    %c0_104 = arith.constant 0 : index
    %229 = vector.load %arg11[%c1_102, %c0_103, %c0_104] : memref<2x64x32xbf16, #tpu.memory_space<vmem>>, vector<1x64x32xbf16>
    %230 = vector.shape_cast %229 : vector<1x64x32xbf16> to vector<64x32xbf16>
    %231 = arith.truncf %228 : vector<16x64xf32> to vector<16x64xbf16>
    %cst_105 = arith.constant dense<0.000000e+00> : vector<16x32xf32>
    %232 = tpu.matmul %231, %230, %cst_105 {dimension_numbers = #tpu.dot_dimension_numbers<[1], [0], [0], [1], [0, 0, 1, 1], [], []>} : vector<16x64xbf16>, vector<64x32xbf16>, vector<16x32xf32> -> vector<16x32xf32>
    %c1_106 = arith.constant 1 : index
    %c0_107 = arith.constant 0 : index
    %c0_108 = arith.constant 0 : index
    %233 = vector.load %arg12[%c1_106, %c0_107, %c0_108] : memref<2x1x32xf32, #tpu.memory_space<vmem>>, vector<1x1x32xf32>
    %234 = vector.shape_cast %233 : vector<1x1x32xf32> to vector<1x32xf32>
    %235 = vector.broadcast %234 : vector<1x32xf32> to vector<16x32xf32>
    %236 = arith.addf %232, %235 : vector<16x32xf32>
    %237 = arith.addf %218, %236 : vector<16x32xf32>
    %c1_109 = arith.constant 1 : index
    %c0_110 = arith.constant 0 : index
    %c0_111 = arith.constant 0 : index
    %238 = vector.load %arg15[%c1_109, %c0_110, %c0_111] : memref<2x1x32xf32, #tpu.memory_space<vmem>>, vector<1x1x32xf32>
    %239 = vector.shape_cast %238 : vector<1x1x32xf32> to vector<1x32xf32>
    %c1_112 = arith.constant 1 : index
    %c0_113 = arith.constant 0 : index
    %c0_114 = arith.constant 0 : index
    %240 = vector.load %arg16[%c1_112, %c0_113, %c0_114] : memref<2x1x32xf32, #tpu.memory_space<vmem>>, vector<1x1x32xf32>
    %241 = vector.shape_cast %240 : vector<1x1x32xf32> to vector<1x32xf32>
    %cst_115 = arith.constant dense<0.000000e+00> : vector<16xf32>
    %242 = vector.multi_reduction <add>, %237, %cst_115 [1] : vector<16x32xf32> to vector<16xf32>
    %243 = vector.shape_cast %242 : vector<16xf32> to vector<16x1xf32>
    %cst_116 = arith.constant 3.200000e+01 : f32
    %244 = vector.broadcast %cst_116 : f32 to vector<16x1xf32>
    %245 = arith.divf %243, %244 : vector<16x1xf32>
    %246 = vector.broadcast %245 : vector<16x1xf32> to vector<16x32xf32>
    %247 = arith.subf %237, %246 : vector<16x32xf32>
    %248 = arith.mulf %247, %247 : vector<16x32xf32>
    %cst_117 = arith.constant dense<0.000000e+00> : vector<16xf32>
    %249 = vector.multi_reduction <add>, %248, %cst_117 [1] : vector<16x32xf32> to vector<16xf32>
    %250 = vector.shape_cast %249 : vector<16xf32> to vector<16x1xf32>
    %cst_118 = arith.constant 3.200000e+01 : f32
    %251 = vector.broadcast %cst_118 : f32 to vector<16x1xf32>
    %252 = arith.divf %250, %251 : vector<16x1xf32>
    %cst_119 = arith.constant 9.99999974E-6 : f32
    %253 = vector.broadcast %cst_119 : f32 to vector<16x1xf32>
    %254 = arith.addf %252, %253 : vector<16x1xf32>
    %255 = math.rsqrt %254 : vector<16x1xf32>
    %256 = vector.broadcast %255 : vector<16x1xf32> to vector<16x32xf32>
    %257 = arith.mulf %247, %256 : vector<16x32xf32>
    %258 = vector.broadcast %239 : vector<1x32xf32> to vector<16x32xf32>
    %259 = arith.mulf %257, %258 : vector<16x32xf32>
    %260 = vector.broadcast %241 : vector<1x32xf32> to vector<16x32xf32>
    %261 = arith.addf %259, %260 : vector<16x32xf32>
    %262 = vector.extract_strided_slice %261 {offsets = [7, 0], sizes = [1, 32], strides = [1, 1]} : vector<16x32xf32> to vector<1x32xf32>
    %263 = vector.extract_strided_slice %261 {offsets = [15, 0], sizes = [1, 32], strides = [1, 1]} : vector<16x32xf32> to vector<1x32xf32>
    %264 = tpu.concatenate %262, %263 in 0 : vector<1x32xf32>, vector<1x32xf32> -> vector<2x32xf32>
    %c0_120 = arith.constant 0 : index
    %c0_121 = arith.constant 0 : index
    %265 = vector.load %arg17[%c0_120, %c0_121] : memref<1x32xf32, #tpu.memory_space<vmem>>, vector<1x32xf32>
    %c0_122 = arith.constant 0 : index
    %c0_123 = arith.constant 0 : index
    %266 = vector.load %arg18[%c0_122, %c0_123] : memref<1x32xf32, #tpu.memory_space<vmem>>, vector<1x32xf32>
    %cst_124 = arith.constant dense<0.000000e+00> : vector<2xf32>
    %267 = vector.multi_reduction <add>, %264, %cst_124 [1] : vector<2x32xf32> to vector<2xf32>
    %268 = vector.shape_cast %267 : vector<2xf32> to vector<2x1xf32>
    %cst_125 = arith.constant 3.200000e+01 : f32
    %269 = vector.broadcast %cst_125 : f32 to vector<2x1xf32>
    %270 = arith.divf %268, %269 : vector<2x1xf32>
    %271 = vector.broadcast %270 : vector<2x1xf32> to vector<2x32xf32>
    %272 = arith.subf %264, %271 : vector<2x32xf32>
    %273 = arith.mulf %272, %272 : vector<2x32xf32>
    %cst_126 = arith.constant dense<0.000000e+00> : vector<2xf32>
    %274 = vector.multi_reduction <add>, %273, %cst_126 [1] : vector<2x32xf32> to vector<2xf32>
    %275 = vector.shape_cast %274 : vector<2xf32> to vector<2x1xf32>
    %cst_127 = arith.constant 3.200000e+01 : f32
    %276 = vector.broadcast %cst_127 : f32 to vector<2x1xf32>
    %277 = arith.divf %275, %276 : vector<2x1xf32>
    %cst_128 = arith.constant 9.99999974E-6 : f32
    %278 = vector.broadcast %cst_128 : f32 to vector<2x1xf32>
    %279 = arith.addf %277, %278 : vector<2x1xf32>
    %280 = math.rsqrt %279 : vector<2x1xf32>
    %281 = vector.broadcast %280 : vector<2x1xf32> to vector<2x32xf32>
    %282 = arith.mulf %272, %281 : vector<2x32xf32>
    %283 = vector.broadcast %265 : vector<1x32xf32> to vector<2x32xf32>
    %284 = arith.mulf %282, %283 : vector<2x32xf32>
    %285 = vector.broadcast %266 : vector<1x32xf32> to vector<2x32xf32>
    %286 = arith.addf %284, %285 : vector<2x32xf32>
    %c0_129 = arith.constant 0 : index
    %c0_130 = arith.constant 0 : index
    %287 = vector.load %arg19[%c0_129, %c0_130] : memref<32x256xbf16, #tpu.memory_space<vmem>>, vector<32x256xbf16>
    %288 = arith.truncf %286 : vector<2x32xf32> to vector<2x32xbf16>
    %cst_131 = arith.constant dense<0.000000e+00> : vector<2x256xf32>
    %289 = tpu.matmul %288, %287, %cst_131 {dimension_numbers = #tpu.dot_dimension_numbers<[1], [0], [0], [1], [0, 0, 1, 1], [], []>} : vector<2x32xbf16>, vector<32x256xbf16>, vector<2x256xf32> -> vector<2x256xf32>
    %c0_132 = arith.constant 0 : index
    %c0_133 = arith.constant 0 : index
    %290 = vector.load %arg20[%c0_132, %c0_133] : memref<1x256xf32, #tpu.memory_space<vmem>>, vector<1x256xf32>
    %291 = vector.broadcast %290 : vector<1x256xf32> to vector<2x256xf32>
    %292 = arith.addf %289, %291 : vector<2x256xf32>
    %cst_134 = arith.constant 0.000000e+00 : f32
    %293 = vector.broadcast %cst_134 : f32 to vector<2x256xf32>
    %294 = arith.maximumf %292, %293 : vector<2x256xf32>
    %c0_135 = arith.constant 0 : index
    %c0_136 = arith.constant 0 : index
    %295 = vector.load %arg21[%c0_135, %c0_136] : memref<1x256xf32, #tpu.memory_space<vmem>>, vector<1x256xf32>
    %296 = vector.broadcast %295 : vector<1x256xf32> to vector<2x256xf32>
    %297 = arith.mulf %294, %296 : vector<2x256xf32>
    %c0_137 = arith.constant 0 : index
    %c0_138 = arith.constant 0 : index
    %298 = vector.load %arg22[%c0_137, %c0_138] : memref<1x256xf32, #tpu.memory_space<vmem>>, vector<1x256xf32>
    %299 = vector.broadcast %298 : vector<1x256xf32> to vector<2x256xf32>
    %300 = arith.addf %297, %299 : vector<2x256xf32>
    %c0_139 = arith.constant 0 : index
    %c0_140 = arith.constant 0 : index
    %301 = vector.load %arg23[%c0_139, %c0_140] : memref<256x6xbf16, #tpu.memory_space<vmem>>, vector<256x6xbf16>
    %302 = arith.truncf %300 : vector<2x256xf32> to vector<2x256xbf16>
    %cst_141 = arith.constant dense<0.000000e+00> : vector<2x6xf32>
    %303 = tpu.matmul %302, %301, %cst_141 {dimension_numbers = #tpu.dot_dimension_numbers<[1], [0], [0], [1], [0, 0, 1, 1], [], []>} : vector<2x256xbf16>, vector<256x6xbf16>, vector<2x6xf32> -> vector<2x6xf32>
    %c0_142 = arith.constant 0 : index
    %c0_143 = arith.constant 0 : index
    %304 = vector.load %arg24[%c0_142, %c0_143] : memref<1x6xf32, #tpu.memory_space<vmem>>, vector<1x6xf32>
    %305 = vector.broadcast %304 : vector<1x6xf32> to vector<2x6xf32>
    %306 = arith.addf %303, %305 : vector<2x6xf32>
    %307 = arith.negf %306 : vector<2x6xf32>
    %308 = math.exp %307 : vector<2x6xf32>
    %cst_144 = arith.constant 1.000000e+00 : f32
    %309 = vector.broadcast %cst_144 : f32 to vector<2x6xf32>
    %310 = arith.addf %309, %308 : vector<2x6xf32>
    %311 = arith.divf %309, %310 : vector<2x6xf32>
    %c0_145 = arith.constant 0 : index
    %c0_146 = arith.constant 0 : index
    %312 = vector.load %arg25[%c0_145, %c0_146] : memref<2x6xf32, #tpu.memory_space<vmem>>, vector<2x6xf32>
    tpu.vector_store %arg25[%c0_145, %c0_146], %311 {strides = array<i32>} : memref<2x6xf32, #tpu.memory_space<vmem>>, vector<2x6xf32>,
    return
  }
}

</mosaic_0001>

<bundles_post_ra>
// kernel: _lambda_.1
= control target key start
LH: loop header
LB: loop body
LE: loop exit
PB: predicated region body
PF: predicated region fallthrough
CT: control target
= control target key end

     0   :  { %s3259_s0 = inlined_call_operand.vmem [shape: f32[16,4], index: 0, kind: input, shape index: {}]   ;;  %s3260_s1 = inlined_call_operand.vmem [shape: f32[16,32], index: 1, kind: input, shape index: {}]   ;;  %s3261_s2 = inlined_call_operand.vmem [shape: f32[64,64], index: 2, kind: input, shape index: {}]   ;;  %s3262_s3 = inlined_call_operand.vmem [shape: bf16[4,32], index: 3, kind: input, shape index: {}]   ;;  %s3263_s4 = inlined_call_operand.vmem [shape: f32[1,32], index: 4, kind: input, shape index: {}]   ;;  %s3264_s5 = inlined_call_operand.vmem [shape: bf16[2,32,96], index: 5, kind: input, shape index: {}]   ;;  %s3265_s6 = inlined_call_operand.vmem [shape: f32[2,1,96], index: 6, kind: input, shape index: {}]   ;;  %s3266_s7 = inlined_call_operand.vmem [shape: bf16[2,32,32], index: 7, kind: input, shape index: {}]   ;;  %s3267_s8 = inlined_call_operand.vmem [shape: f32[2,1,32], index: 8, kind: input, shape index: {}]   ;;  %s3268_s9 = inlined_call_operand.vmem [shape: bf16[2,32,64], index: 9, kind: input, shape index: {}]   ;;  %s3269_s10 = inlined_call_operand.vmem [shape: f32[2,1,64], index: 10, kind: input, shape index: {}]   ;;  %s3270_s11 = inlined_call_operand.vmem [shape: bf16[2,64,32], index: 11, kind: input, shape index: {}]   ;;  %s3271_s12 = inlined_call_operand.vmem [shape: f32[2,1,32], index: 12, kind: input, shape index: {}]   ;;  %s3272_s13 = inlined_call_operand.vmem [shape: f32[2,1,32], index: 13, kind: input, shape index: {}]   ;;  %s3273_s14 = inlined_call_operand.vmem [shape: f32[2,1,32], index: 14, kind: input, shape index: {}]   ;;  %s3274_s15 = inlined_call_operand.vmem [shape: f32[2,1,32], index: 15, kind: input, shape index: {}]   ;;  %s3275_s16 = inlined_call_operand.vmem [shape: f32[2,1,32], index: 16, kind: input, shape index: {}]   ;;  %s3276_s17 = inlined_call_operand.vmem [shape: f32[1,32], index: 17, kind: input, shape index: {}]   ;;  %s3277_s18 = inlined_call_operand.vmem [shape: f32[1,32], index: 18, kind: input, shape index: {}]   ;;  %s3278_s19 = inlined_call_operand.vmem [shape: bf16[32,256], index: 19, kind: input, shape index: {}]   ;;  %s3279_s20 = inlined_call_operand.vmem [shape: f32[1,256], index: 20, kind: input, shape index: {}]   ;;  %s3280_s21 = inlined_call_operand.vmem [shape: f32[1,256], index: 21, kind: input, shape index: {}]   ;;  %s3281_s22 = inlined_call_operand.vmem [shape: f32[1,256], index: 22, kind: input, shape index: {}]   ;;  %s3282_s23 = inlined_call_operand.vmem [shape: bf16[256,6], index: 23, kind: input, shape index: {}]   ;;  %s3283_s24 = inlined_call_operand.vmem [shape: f32[1,6], index: 24, kind: input, shape index: {}]   ;;  %s3284_s25 = inlined_call_operand.hbm [shape: f32[2,6], index: 25, kind: output, shape index: {}]  }
   0x1   :  { %3298 = sst [smem:[#allocation5_spill]] %s3259_s0 }
   0x2   :  { %3299 = sst [smem:[#allocation6_spill]] %s3260_s1 }
   0x3   :  { %3300 = sst [smem:[#allocation7_spill]] %s3261_s2 }
   0x4   :  { %3301 = sst [smem:[#allocation8_spill]] %s3262_s3 }
   0x5   :  { %3302 = sst [smem:[#allocation9_spill]] %s3263_s4 }
   0x6   :  { %3303 = sst [smem:[#allocation10_spill]] %s3264_s5 }
   0x7   :  { %3304 = sst [smem:[#allocation11_spill]] %s3265_s6 }
   0x8   :  { %3305 = sst [smem:[#allocation12_spill]] %s3266_s7 }
   0x9   :  { %3306 = sst [smem:[#allocation13_spill]] %s3267_s8 }
   0xa   :  { %3307 = sst [smem:[#allocation14_spill]] %s3268_s9 }
   0xb   :  { %s3308_s6 = sld [smem:[#allocation8_spill]]  ;;  %vm105_vm0 = vcmask 1041408   ;;  %s3309_s3 = sld [smem:[#allocation5_spill]]  ;;  %v2611_v2 = vmov 0.0   ;;  %vm2612_vm1 = vmmov 0   ;;  %vm101_vm2 = vcmask 31744  }
   0xc   :  { %2207 = vmatprep.subr.bf16.mxu0 %v2611_v2  ;;  %2209 = vmatprep.mubr.msk.bf16.mxu0 %vm2612_vm1, %v2611_v2 }
   0xd   :  { %2213 = vmatprep.subr.bf16.mxu1 %v2611_v2  ;;  %2217 = vmatprep.mubr.msk.bf16.mxu1 %vm2612_vm1, %v2611_v2 }
  0x11   :  { %v92_v0 = vld [vmem:[%s3308_s6] sm:$0x3]  ;;  %v91_v4 = vld [vmem:[%s3309_s3 + $0x8] sm:$0xff] }
  0x12   :  { %v90_v1 = vld [vmem:[%s3309_s3] sm:$0xff]  ;;  %v107_v3 = vsel %vm105_vm0, %v92_v0, 0 }
  0x13   :  { %2208 = vmatpush3.bf16.msra.mxu0 %v107_v3  ;;  %v93_v5 = vpack.c.bf16 %v91_v4, %v90_v1 }
  0x16   :  { %2210 = vmatmul.mubr.msk.bf16.vlgmr.msra.gmra.mrb[0].mxu0 %vm101_vm2, %v93_v5 }
  0x17   :  { %30 = vsyncpa [#allocation3], 0  ;;  %s3310_s4 = sld [smem:[#allocation10_spill]]  ;;  %s3311_s29 = sld [smem:[#allocation9_spill]]  ;;  %vm178_vm3 = vcmask 261120   ;;  %vm285_vm4 = vcmask 64512  }
  0x18   :  { %s3312_s30 = sld [smem:[#allocation6_spill]]  ;;  %s3313_s8 = sld [smem:[#allocation11_spill]]  ;;  %vm375_vm5 = vcmask 523264   ;;  %vm583_vm6 = vcmask 130048   ;;  %vm586_vm7 = vcmask 195584   ;;  %vm1666_vm8 = vcmask 1040384  }
  0x19   :  { %s2613_s27 = smov 104   ;;  %s2614_s28 = smov 120   ;;  %vm1670_vm9 = vcmask 254976   ;;  %vm1992_vm10 = vcmask 41984  }
  0x1a   :  { %s2615_s9 = smov 112   ;;  %s2616_s5 = smov 96  }
  0x1b   :  { %s3314_s2 = sld [smem:[#allocation7_spill]]  ;;  %s3296_s0 = smov 64  }
  0x1c   :  { %s3315_s6 = sld [smem:[#allocation12_spill]]  ;;  %s3295_s3 = smov 8  }
  0x1d   :  { %v2459_v6 = vld [vmem:[%s3310_s4] sm:$0xff]   ;;  %v2460_v7 = vld [vmem:[%s3310_s4 + $0x8] sm:$0xff]   ;;  %s3294_s26 = smov 24   ;;  %s3293_s1 = smov 16  }
  0x1e   :  { %2214 = vmatpush3.bf16.msra.mxu1 %v2459_v6  ;;  %v2008_v8 = vld [vmem:[%s3311_s29] ss:$0 sm:$0xff]  ;;  %v151_v14 = vld [vmem:[%s3312_s30 + $0x8] sm:$0xff]  ;;  %s3317_s29 = sld [smem:[#allocation14_spill]] }
  0x1f   :  { %2215 = vmatprep.subr.bf16.mxu1 %v2611_v2  ;;  %v150_v12 = vld [vmem:[%s3312_s30] sm:$0xff]  ;;  %s3316_s30 = sld [smem:[#allocation13_spill]] }
  0x20   :  { %v2010_v20 = vld [vmem:[%s3313_s8] ss:$0 sm:$0xff] }
  0x21   :  { %v2831_v1 = vld [vmem:[%s3314_s2] sm:$0xff]  ;;  %v2836_v4 = vld [vmem:[%s3314_s2 + $0x10] sm:$0xff]  ;;  %v2841_v6 = vld [vmem:[%s3314_s2 + $0x8] sm:$0xff] }
  0x22   :  { %2216 = vmatpush3.bf16.msra.mxu1 %v2460_v7 }
  0xe9   :  { %v143_v9 = vpop.f32.mrb[0].mxu0 }
  0xea   :  { %v144_v10 = vadd.f32 %v2008_v8, %v143_v9  ;;  %v2211_v11 = vpop.f32.mrb[1].mxu0 }
  0xeb   :  { %v146_v13 = vpop.f32.mrb[2].mxu0 }
  0xec   :  { %v147_v15 = vadd.f32 %v2008_v8, %v146_v13  ;;  %v2212_v16 = vpop.f32.mrb[3].mxu0  ;;  %v2784_v17 = vadd.f32 %v150_v12, %v144_v10  ;;  %v2850_v13 = vld [vmem:[%s3314_s2 + $0x18] sm:$0xff] }
  0xee   :  { %v2786_v18 = vadd.f32 %v151_v14, %v147_v15  ;;  %v2856_v15 = vld [vmem:[%s3314_s2 + $0x20] sm:$0xff] }
  0xf0   :  { %v158_v19 = vpack.c.bf16 %v2786_v18, %v2784_v17 }
  0xf2   :  { %2218 = vmatmul.mubr.msk.bf16.vlgmr.msra.gmra.mrb[0].mxu1 %vm178_vm3, %v158_v19 }
 0x1c5   :  { %v216_v21 = vpop.f32.mrb[0].mxu1 }
 0x1c6   :  { %v217_v22 = vadd.f32 %v2010_v20, %v216_v21  ;;  %v2219_v23 = vpop.f32.mrb[1].mxu1  ;;  %v2863_v21 = vld [vmem:[%s3314_s2 + $0x30] sm:$0xff] }
 0x1c7   :  { %v219_v24 = vpop.f32.mrb[2].mxu1  ;;  %v2868_v23 = vld [vmem:[%s3314_s2 + $0x28] sm:$0xff] }
 0x1c8   :  { %v220_v25 = vadd.f32 %v2010_v20, %v219_v24  ;;  %v2220_v26 = vpop.f32.mrb[3].mxu1  ;;  %v223_v27 = vmul.f32 0.35355338, %v217_v22 }
 0x1ca   :  { %v224_v28 = vmul.f32 0.35355338, %v220_v25  ;;  %v2379_v29 = vpack.i.bf16 %v220_v25, %v217_v22  ;;  %v2794_v30 = vpack.c.bf16 %v220_v25, %v217_v22 }
 0x1cc   :  { %2380 = vrot.lane.b32.xlu1 %v2379_v29, %s2613_s27  ;;  %2370 = vrot.lane.b32.xlu0 %v2379_v29, %s2614_s28  ;;  %v245_v31 = vpack.c.bf16 %v224_v28, %v223_v27  ;;  %v2389_v32 = vpack.i.bf16 %v224_v28, %v223_v27 }
 0x1ce   :  { %2229 = vmatprep.mubr.msk.bf16.mxu0 %vm285_vm4, %v245_v31 }
 0x1d0   :  { %2375 = vrot.lane.b32.xlu0 %v2379_v29, %s2615_s9  ;;  %277 = vrot.lane.b32.xlu1 %v2794_v30, %s2616_s5 }
 0x23e   :  { %v2381_v33 = vpop.permute.xlu1 %2380  ;;  %v2371_v34 = vpop.permute.xlu0 %2370 }
 0x23f   :  { %v2373_v35 = vunpack.i.h.bf16 %v2371_v34  ;;  %v2372_v36 = vunpack.i.l.bf16 %v2371_v34  ;;  %v2383_v37 = vunpack.i.h.bf16 %v2381_v33  ;;  %v2382_v38 = vunpack.i.l.bf16 %v2381_v33 }
 0x241   :  { %v2802_v39 = vpack.c.bf16 %v2373_v35, %v2372_v36  ;;  %v2808_v45 = vpack.c.bf16 %v2383_v37, %v2382_v38 }
 0x242   :  { %v2376_v40 = vpop.permute.xlu0 %2375  ;;  %v278_v41 = vpop.permute.xlu1 %277 }
 0x243   :  { %v2378_v42 = vunpack.i.h.bf16 %v2376_v40  ;;  %v2377_v43 = vunpack.i.l.bf16 %v2376_v40  ;;  %v299_v44 = vsel %vm285_vm4, %v278_v41, 0  ;;  %279 = vrot.lane.b32.xlu0 %v2802_v39, %s2616_s5  ;;  %2349 = vmatprep.subr.msk.bf16.mxu0 %vm285_vm4, %v278_v41 }
 0x244   :  { %2222 = vmatpush3.bf16.xpose.msra.mxu0 %v299_v44 }
 0x245   :  { %v2810_v46 = vpack.c.bf16 %v2378_v42, %v2377_v43 }
 0x247   :  { %283 = vrot.lane.b32.xlu0 %v2808_v45, %s2616_s5  ;;  %281 = vrot.lane.b32.xlu1 %v2810_v46, %s2616_s5 }
 0x24b   :  { %2390 = vrot.lane.b32.xlu0 %v2389_v32, %s2615_s9  ;;  %2385 = vrot.lane.b32.xlu1 %v2389_v32, %s2614_s28 }
 0x24f   :  { %2395 = vrot.lane.b32.xlu1 %v2389_v32, %s2613_s27  ;;  %v2878_v32 = vld [vmem:[%s3314_s2 + $0x38] sm:$0xff]  ;;  %s3319_s2 = smov 8  }
 0x2b5   :  { %v280_v47 = vpop.permute.xlu0 %279 }
 0x2b6   :  { %v302_v48 = vsel %vm285_vm4, %v280_v47, 0  ;;  %2350 = vmatprep.subr.msk.bf16.mxu0 %vm285_vm4, %v280_v47 }
 0x2b7   :  { %2224 = vmatpush3.bf16.xpose.msra.mxu0 %v302_v48 }
 0x2b9   :  { %v282_v49 = vpop.permute.xlu1 %281  ;;  %v284_v51 = vpop.permute.xlu0 %283 }
 0x2ba   :  { %2351 = vmatprep.subr.msk.bf16.mxu0 %vm285_vm4, %v282_v49  ;;  %v305_v50 = vsel %vm285_vm4, %v282_v49, 0  ;;  %v308_v53 = vsel %vm285_vm4, %v284_v51, 0 }
 0x2bd   :  { %v2386_v52 = vpop.permute.xlu1 %2385  ;;  %v2391_v54 = vpop.permute.xlu0 %2390 }
 0x2be   :  { %v2388_v55 = vunpack.i.h.bf16 %v2386_v52  ;;  %v2387_v56 = vunpack.i.l.bf16 %v2386_v52  ;;  %v2393_v57 = vunpack.i.h.bf16 %v2391_v54  ;;  %v2392_v58 = vunpack.i.l.bf16 %v2391_v54 }
 0x2bf   :  { %2226 = vmatpush3.bf16.xpose.msra.mxu0 %v305_v50 }
 0x2c0   :  { %2352 = vmatprep.subr.msk.bf16.mxu0 %vm285_vm4, %v284_v51  ;;  %v246_v59 = vpack.c.bf16 %v2388_v55, %v2387_v56  ;;  %v247_v60 = vpack.c.bf16 %v2393_v57, %v2392_v58 }
 0x2c1   :  { %v2396_v61 = vpop.permute.xlu1 %2395 }
 0x2c2   :  { %v2398_v62 = vunpack.i.h.bf16 %v2396_v61  ;;  %v2397_v63 = vunpack.i.l.bf16 %v2396_v61 }
 0x2c4   :  { %v248_v0 = vpack.c.bf16 %v2398_v62, %v2397_v63 }
 0x2c7   :  { %2228 = vmatpush3.bf16.xpose.msra.mxu0 %v308_v53 }
 0x2ce   :  { %2230 = vmatmul.mubr.msk.bf16.vlgmr.msra.gmra.mrb[4].mxu0 %vm285_vm4, %v246_v59 }
 0x2cf   :  { %2233 = vmatprep.mubr.msk.bf16.mxu0 %vm285_vm4, %v247_v60 }
 0x2d6   :  { %2234 = vmatmul.mubr.msk.bf16.gmra.mrb[8].mxu0 %vm285_vm4, %v248_v0 }
 0x3a1   :  { %v2231_v3 = vpop.f32.mrb[4].mxu0 }
 0x3a2   :  { %v344_v5 = vpop.f32.mrb[5].mxu0  ;;  %v353_v10 = vadd.f32 %v2231_v3, %v2836_v4 }
 0x3a3   :  { %v345_v7 = vadd.f32 %v344_v5, %v2831_v1  ;;  %v2232_v8 = vpop.f32.mrb[6].mxu0 }
 0x3a4   :  { %v347_v9 = vpop.f32.mrb[7].mxu0  ;;  %v356_v16 = vadd.f32 %v2232_v8, %v2850_v13  ;;  %v382_v20 = vsel %vm375_vm5, %v353_v10, -inf }
 0x3a5   :  { %v348_v11 = vadd.f32 %v347_v9, %v2841_v6  ;;  %v376_v12 = vsel %vm375_vm5, %v345_v7, -inf }
 0x3a6   :  { %377 = vmax.xlane.f32.xlu0 %v376_v12  ;;  %v385_v31 = vsel %vm375_vm5, %v356_v16, -inf }
 0x3a7   :  { %v379_v14 = vsel %vm375_vm5, %v348_v11, -inf }
 0x3a8   :  { %380 = vmax.xlane.f32.xlu1 %v379_v14 }
 0x3a9   :  { %v2235_v19 = vpop.f32.mrb[8].mxu0 }
 0x3aa   :  { %v360_v22 = vpop.f32.mrb[9].mxu0  ;;  %383 = vmax.xlane.f32.xlu0 %v382_v20  ;;  %v369_v27 = vadd.f32 %v2235_v19, %v2863_v21 }
 0x3ab   :  { %v361_v24 = vadd.f32 %v360_v22, %v2856_v15  ;;  %v2236_v25 = vpop.f32.mrb[10].mxu0 }
 0x3ac   :  { %v363_v26 = vpop.f32.mrb[11].mxu0  ;;  %v372_v33 = vadd.f32 %v2236_v25, %v2878_v32  ;;  %v394_v34 = vsel %vm375_vm5, %v369_v27, -inf }
 0x3ad   :  { %v364_v28 = vadd.f32 %v363_v26, %v2868_v23  ;;  %v388_v29 = vsel %vm375_vm5, %v361_v24, -inf }
 0x3ae   :  { %389 = vmax.xlane.f32.xlu1 %v388_v29  ;;  %386 = vmax.xlane.f32.xlu0 %v385_v31  ;;  %v397_v36 = vsel %vm375_vm5, %v372_v33, -inf }
 0x3af   :  { %v391_v35 = vsel %vm375_vm5, %v364_v28, -inf }
 0x3b2   :  { %395 = vmax.xlane.f32.xlu1 %v394_v34  ;;  %392 = vmax.xlane.f32.xlu0 %v391_v35 }
 0x3b6   :  { %398 = vmax.xlane.f32.xlu0 %v397_v36 }
 0x3c3   :  { %468 = vrot.lane.b32.xlu1 %v2794_v30, %s3296_s0 }
 0x433   :  { %v378_v37 = vpop.xlane.xlu0 %377 }
 0x434   :  { %v400_v38 = vsub.f32 %v345_v7, %v378_v37 }
 0x435   :  { %v381_v40 = vpop.xlane.xlu1 %380 }
 0x436   :  { %v408_v43 = vmul.f32 1.442695, %v400_v38  ;;  %v401_v47 = vsub.f32 %v348_v11, %v381_v40 }
 0x437   :  { %v384_v41 = vpop.xlane.xlu0 %383 }
 0x438   :  { %v402_v42 = vsub.f32 %v353_v10, %v384_v41  ;;  %v410_v53 = vmul.f32 1.442695, %v401_v47 }
 0x43a   :  { %v412_v44 = vmul.f32 1.442695, %v402_v42 }
 0x43b   :  { %v390_v48 = vpop.xlane.xlu1 %389  ;;  %v387_v49 = vpop.xlane.xlu0 %386 }
 0x43c   :  { %2501 = vpow2.f32 %v412_v44  ;;  %v403_v50 = vsub.f32 %v356_v16, %v387_v49  ;;  %v404_v51 = vsub.f32 %v361_v24, %v390_v48 }
 0x43d   :  { %2503 = vpow2.f32 %v408_v43 }
 0x43e   :  { %v414_v52 = vmul.f32 1.442695, %v403_v50  ;;  %v416_v30 = vmul.f32 1.442695, %v404_v51 }
 0x43f   :  { %v396_v54 = vpop.xlane.xlu1 %395  ;;  %v393_v55 = vpop.xlane.xlu0 %392 }
 0x440   :  { %v406_v56 = vsub.f32 %v369_v27, %v396_v54  ;;  %2505 = vpow2.f32 %v414_v52  ;;  %v405_v58 = vsub.f32 %v364_v28, %v393_v55 }
 0x441   :  { %2507 = vpow2.f32 %v410_v53 }
 0x442   :  { %v420_v57 = vmul.f32 1.442695, %v406_v56  ;;  %v418_v0 = vmul.f32 1.442695, %v405_v58  ;;  %v2461_v58 = vld [vmem:[%s3315_s6] sm:$0xff]  }
 0x443   :  { %v469_v59 = vpop.permute.xlu1 %468  ;;  %v399_v60 = vpop.xlane.xlu0 %398 }
 0x444   :  { %2509 = vpow2.f32 %v420_v57  ;;  %v407_v61 = vsub.f32 %v372_v33, %v399_v60  ;;  %2237 = vmatprep.subr.bf16.mxu1 %v469_v59 }
 0x445   :  { %2238 = vmatpush3.bf16.msra.mxu1 %v469_v59  ;;  %2511 = vpow2.f32 %v416_v30  ;;  %v2462_v59 = vld [vmem:[%s3315_s6 + $0x8] sm:$0xff]  }
 0x446   :  { %v2886_v62 = vpop.eup %2501  ;;  %v422_v63 = vmul.f32 1.442695, %v407_v61 }
 0x447   :  { %v430_v3 = vsel %vm375_vm5, %v2886_v62, 0.0  ;;  %v2504_v5 = vpop.eup %2503 }
 0x448   :  { %2513 = vpow2.f32 %v422_v63  ;;  %431 = vadd.xlane.f32.xlu1 %v430_v3  ;;  %v424_v8 = vsel %vm375_vm5, %v2504_v5, 0.0 }
 0x449   :  { %2515 = vpow2.f32 %v418_v0 }
 0x44a   :  { %v2506_v7 = vpop.eup %2505 }
 0x44b   :  { %v433_v9 = vsel %vm375_vm5, %v2506_v7, 0.0  ;;  %v2508_v10 = vpop.eup %2507 }
 0x44c   :  { %425 = vadd.xlane.f32.xlu1 %v424_v8  ;;  %434 = vadd.xlane.f32.xlu0 %v433_v9  ;;  %v427_v16 = vsel %vm375_vm5, %v2508_v10, 0.0 }
 0x44e   :  { %v2892_v11 = vpop.eup %2509 }
 0x44f   :  { %v442_v12 = vsel %vm375_vm5, %v2892_v11, 0.0  ;;  %v2512_v14 = vpop.eup %2511 }
 0x450   :  { %443 = vadd.xlane.f32.xlu1 %v442_v12  ;;  %428 = vadd.xlane.f32.xlu0 %v427_v16  ;;  %v436_v20 = vsel %vm375_vm5, %v2512_v14, 0.0 }
 0x452   :  { %v2514_v19 = vpop.eup %2513 }
 0x453   :  { %v445_v22 = vsel %vm375_vm5, %v2514_v19, 0.0  ;;  %v2516_v24 = vpop.eup %2515 }
 0x454   :  { %437 = vadd.xlane.f32.xlu1 %v436_v20  ;;  %446 = vadd.xlane.f32.xlu0 %v445_v22  ;;  %v439_v25 = vsel %vm375_vm5, %v2516_v24, 0.0 }
 0x458   :  { %440 = vadd.xlane.f32.xlu0 %v439_v25 }
 0x465   :  { %472 = vrot.lane.b32.xlu1 %v2810_v46, %s3296_s0 }
 0x469   :  { %474 = vrot.lane.b32.xlu1 %v2808_v45, %s3296_s0 }
 0x46e   :  { %470 = vrot.lane.b32.xlu0 %v2802_v39, %s3296_s0 }
 0x4d5   :  { %v432_v26 = vpop.xlane.xlu1 %431 }
 0x4d9   :  { %v426_v27 = vpop.xlane.xlu1 %425  ;;  %v435_v28 = vpop.xlane.xlu0 %434 }
 0x4da   :  { %2517 = vrcp.f32 %v426_v27 }
 0x4dd   :  { %v444_v29 = vpop.xlane.xlu1 %443  ;;  %v429_v31 = vpop.xlane.xlu0 %428 }
 0x4de   :  { %2519 = vrcp.f32 %v429_v31 }
 0x4df   :  { %2521 = vrcp.f32 %v435_v28 }
 0x4e0   :  { %2523 = vrcp.f32 %v432_v26 }
 0x4e1   :  { %v447_v33 = vpop.xlane.xlu0 %446  ;;  %v438_v34 = vpop.xlane.xlu1 %437 }
 0x4e2   :  { %2525 = vrcp.f32 %v438_v34 }
 0x4e4   :  { %v2518_v46 = vpop.eup %2517 }
 0x4e5   :  { %v441_v35 = vpop.xlane.xlu0 %440  ;;  %v473_v45 = vpop.permute.xlu1 %472  ;;  %v456_v38 = vmul.f32 %v2518_v46, %v2504_v5 }
 0x4e6   :  { %2527 = vrcp.f32 %v441_v35  ;;  %v2022_v35 = vld [vmem:[%s3316_s30] ss:$0 sm:$0xff] }
 0x4e7   :  { %2529 = vrcp.f32 %v447_v33 }
 0x4e8   :  { %v2520_v36 = vpop.eup %2519  ;;  %2531 = vrcp.f32 %v444_v29 }
 0x4e9   :  { %v471_v37 = vpop.permute.xlu0 %470  ;;  %v457_v39 = vmul.f32 %v2520_v36, %v2508_v10  ;;  %v2522_v41 = vpop.eup %2521 }
 0x4ea   :  { %2239 = vmatprep.subr.bf16.mxu1 %v471_v37  ;;  %v2524_v42 = vpop.eup %2523  ;;  %v475_v44 = vpop.permute.xlu1 %474  ;;  %v459_v48 = vmul.f32 %v2522_v41, %v2506_v7 }
 0x4eb   :  { %2240 = vmatpush3.bf16.msra.mxu1 %v471_v37  ;;  %v464_v40 = vpack.c.bf16 %v457_v39, %v456_v38  ;;  %v458_v50 = vmul.f32 %v2524_v42, %v2886_v62 }
 0x4ec   :  { %2241 = vmatprep.subr.bf16.mxu1 %v473_v45  ;;  %v2526_v43 = vpop.eup %2525 }
 0x4ed   :  { %2245 = vmatprep.mubr.msk.bf16.mxu1 %vm375_vm5, %v464_v40  ;;  %v460_v51 = vmul.f32 %v2526_v43, %v2512_v14  ;;  %v465_v52 = vpack.c.bf16 %v459_v48, %v458_v50 }
 0x4ef   :  { %2242 = vmatpush3.bf16.msra.mxu1 %v473_v45 }
 0x4f0   :  { %v2528_v47 = vpop.eup %2527  ;;  %2243 = vmatprep.subr.bf16.mxu1 %v475_v44 }
 0x4f1   :  { %v461_v49 = vmul.f32 %v2528_v47, %v2516_v24  ;;  %v2530_v53 = vpop.eup %2529 }
 0x4f2   :  { %v2532_v55 = vpop.eup %2531  ;;  %v463_v56 = vmul.f32 %v2530_v53, %v2514_v19 }
 0x4f3   :  { %2244 = vmatpush3.bf16.msra.mxu1 %v475_v44  ;;  %v466_v54 = vpack.c.bf16 %v461_v49, %v460_v51  ;;  %v462_v30 = vmul.f32 %v2532_v55, %v2892_v11  ;;  %v2464_v55 = vld [vmem:[%s3317_s29 + $0x8] sm:$0xff]  }
 0x4f4   :  { %2253 = vmatprep.subr.bf16.mxu1 %v2611_v2 }
 0x4f5   :  { %v467_v57 = vpack.c.bf16 %v463_v56, %v462_v30 }
 0x4f6   :  { %2246 = vmatmul.mubr.msk.bf16.vlgmr.msra.gmra.mrb[4].mxu1 %vm375_vm5, %v465_v52 }
 0x4f7   :  { %2249 = vmatprep.mubr.msk.bf16.mxu1 %vm375_vm5, %v466_v54  ;;  %2254 = vmatpush3.bf16.msra.mxu1 %v2461_v58 }
 0x4f8   :  { %2255 = vmatprep.subr.bf16.mxu1 %v2611_v2 }
 0x4fb   :  { %2256 = vmatpush3.bf16.msra.mxu1 %v2462_v59 }
 0x4fc   :  { %2261 = vmatprep.subr.bf16.mxu1 %v2611_v2 }
 0x4fe   :  { %2250 = vmatmul.mubr.msk.bf16.gmra.mrb[8].mxu1 %vm375_vm5, %v467_v57 }
 0x4ff   :  { %2257 = vmatprep.mubr.msk.bf16.mxu1 %vm2612_vm1, %v2611_v2 }
 0x5c9   :  { %v2247_v60 = vpop.f32.mrb[4].mxu1 }
 0x5ca   :  { %v526_v61 = vpop.f32.mrb[5].mxu1 }
 0x5cb   :  { %v2248_v62 = vpop.f32.mrb[6].mxu1 }
 0x5cc   :  { %v2399_v63 = vpack.i.bf16 %v2248_v62, %v2247_v60  ;;  %v529_v0 = vpop.f32.mrb[7].mxu1  ;;  %v2026_v62 = vld [vmem:[%s3272_s13] ss:$0 sm:$0xff] }
 0x5ce   :  { %2400 = vrot.lane.b32.xlu0 %v2399_v63, %s3295_s3 }
 0x5d1   :  { %v2251_v3 = vpop.f32.mrb[8].mxu1 }
 0x5d2   :  { %v542_v5 = vpop.f32.mrb[9].mxu1 }
 0x5d3   :  { %v2252_v7 = vpop.f32.mrb[10].mxu1 }
 0x5d4   :  { %v2409_v8 = vpack.i.bf16 %v2252_v7, %v2251_v3  ;;  %v545_v9 = vpop.f32.mrb[11].mxu1  ;;  %v2027_v7 = vld [vmem:[%s3273_s14] ss:$0 sm:$0xff] }
 0x5d5   :  { %v2404_v10 = vpack.i.bf16 %v545_v9, %v542_v5 }
 0x5d6   :  { %2410 = vrot.lane.b32.xlu0 %v2409_v8, %s3294_s26  ;;  %s3320_s26 = smov 24  }
 0x5d7   :  { %2405 = vrot.lane.b32.xlu1 %v2404_v10, %s3293_s1  ;;  %s3321_s1 = smov 16  }
 0x640   :  { %v2401_v11 = vpop.permute.xlu0 %2400 }
 0x641   :  { %v2403_v12 = vunpack.i.h.bf16 %v2401_v11  ;;  %v2402_v14 = vunpack.i.l.bf16 %v2401_v11  ;;  %v2465_v11 = vld [vmem:[%s3270_s11] sm:$0xff]  }
 0x643   :  { %v581_v24 = vsel %vm285_vm4, %v526_v61, %v2402_v14  ;;  %v582_v25 = vsel %vm285_vm4, %v529_v0, %v2403_v12  ;;  %v2466_v14 = vld [vmem:[%s3270_s11 + $0x8] sm:$0xff]  }
 0x648   :  { %v2411_v16 = vpop.permute.xlu0 %2410 }
 0x649   :  { %v2406_v19 = vpop.permute.xlu1 %2405  ;;  %v2413_v26 = vunpack.i.h.bf16 %v2411_v16  ;;  %v2412_v27 = vunpack.i.l.bf16 %v2411_v16  ;;  %v2467_v16 = vld [vmem:[%s3270_s11 + $0x10] sm:$0xff]  }
 0x64a   :  { %v2408_v20 = vunpack.i.h.bf16 %v2406_v19  ;;  %v2407_v22 = vunpack.i.l.bf16 %v2406_v19  ;;  %v2468_v19 = vld [vmem:[%s3270_s11 + $0x18] sm:$0xff]  }
 0x64c   :  { %v585_v28 = vsel %vm583_vm6, %v582_v25, %v2408_v20  ;;  %v584_v29 = vsel %vm583_vm6, %v581_v24, %v2407_v22  ;;  %v2028_v20 = vld [vmem:[%s3269_s10] ss:$0 sm:$0xff] }
 0x64d   :  { %v588_v31 = vsel %vm586_vm7, %v585_v28, %v2413_v26  ;;  %v587_v33 = vsel %vm586_vm7, %v584_v29, %v2412_v27 }
 0x64e   :  { %v593_v34 = vpack.c.bf16 %v588_v31, %v587_v33 }
 0x650   :  { %2258 = vmatmul.mubr.msk.bf16.vlgmr.msra.gmra.mrb[12].mxu1 %vm178_vm3, %v593_v34  ;;  %v2032_v34 = vld [vmem:[%s3271_s12] ss:$0 sm:$0xff] }
 0x651   :  { %2265 = vmatprep.mubr.msk.bf16.mxu1 %vm2612_vm1, %v2611_v2 }
 0x723   :  { %v650_v46 = vpop.f32.mrb[12].mxu1 }
 0x724   :  { %v651_v36 = vadd.f32 %v2022_v35, %v650_v46  ;;  %v2259_v45 = vpop.f32.mrb[13].mxu1 }
 0x725   :  { %v653_v37 = vpop.f32.mrb[14].mxu1 }
 0x726   :  { %v654_v38 = vadd.f32 %v2022_v35, %v653_v37  ;;  %v2260_v39 = vpop.f32.mrb[15].mxu1  ;;  %v657_v40 = vadd.f32 %v651_v36, %v2784_v17 }
 0x728   :  { %v661_v41 = vsel %vm178_vm3, %v657_v40, 0.0  ;;  %v658_v42 = vadd.f32 %v654_v38, %v2786_v18  ;;  %v2463_v18 = vld [vmem:[%s3317_s29] sm:$0xff]  }
 0x729   :  { %662 = vadd.xlane.f32.xlu1 %v661_v41  ;;  %2262 = vmatpush3.bf16.msra.mxu1 %v2463_v18  ;;  %v2470_v18 = vld [vmem:[%s3310_s4 + $0x18] sm:$0xff]  }
 0x72a   :  { %v664_v43 = vsel %vm178_vm3, %v658_v42, 0.0  ;;  %2263 = vmatprep.subr.bf16.mxu1 %v2611_v2 }
 0x72b   :  { %665 = vadd.xlane.f32.xlu0 %v664_v43 }
 0x72d   :  { %2264 = vmatpush3.bf16.msra.mxu1 %v2464_v55 }
 0x72e   :  { %2269 = vmatprep.subr.bf16.mxu1 %v2611_v2 }
 0x7b6   :  { %v663_v44 = vpop.xlane.xlu1 %662 }
 0x7b7   :  { %v668_v47 = vmul.f32 0.03125, %v663_v44 }
 0x7b8   :  { %v666_v48 = vpop.xlane.xlu0 %665 }
 0x7b9   :  { %v670_v49 = vsub.f32 %v657_v40, %v668_v47  ;;  %v669_v50 = vmul.f32 0.03125, %v666_v48 }
 0x7bb   :  { %v671_v51 = vsub.f32 %v658_v42, %v669_v50  ;;  %v672_v52 = vmul.f32 %v670_v49, %v670_v49 }
 0x7bd   :  { %v674_v53 = vsel %vm178_vm3, %v672_v52, 0.0  ;;  %v673_v54 = vmul.f32 %v671_v51, %v671_v51 }
 0x7be   :  { %675 = vadd.xlane.f32.xlu0 %v674_v53 }
 0x7bf   :  { %v677_v17 = vsel %vm178_vm3, %v673_v54, 0.0 }
 0x7c0   :  { %678 = vadd.xlane.f32.xlu1 %v677_v17  ;;  %v2469_v17 = vld [vmem:[%s3310_s4 + $0x10] sm:$0xff]  }
 0x84b   :  { %v676_v56 = vpop.xlane.xlu0 %675 }
 0x84c   :  { %v680_v30 = vmul.f32 0.03125, %v676_v56 }
 0x84d   :  { %v679_v57 = vpop.xlane.xlu1 %678 }
 0x84e   :  { %v682_v58 = vadd.f32 1e-05, %v680_v30  ;;  %v681_v59 = vmul.f32 0.03125, %v679_v57 }
 0x850   :  { %2533 = vrsqrt.f32 %v682_v58  ;;  %v683_v60 = vadd.f32 1e-05, %v681_v59 }
 0x852   :  { %2535 = vrsqrt.f32 %v683_v60 }
 0x85a   :  { %v2534_v61 = vpop.eup %2533 }
 0x85b   :  { %v686_v63 = vmul.f32 %v2534_v61, %v670_v49  ;;  %v2038_v61 = vld [vmem:[%s3274_s15] ss:$0 sm:$0xff] }
 0x85c   :  { %v2536_v0 = vpop.eup %2535 }
 0x85d   :  { %v694_v3 = vmul.f32 %v2026_v62, %v686_v63  ;;  %v687_v5 = vmul.f32 %v2536_v0, %v671_v51 }
 0x85f   :  { %v695_v8 = vmul.f32 %v2026_v62, %v687_v5  ;;  %v702_v9 = vadd.f32 %v2027_v7, %v694_v3  ;;  %v2039_v5 = vld [vmem:[%s3275_s16] ss:$0 sm:$0xff] }
 0x861   :  { %v703_v10 = vadd.f32 %v2027_v7, %v695_v8 }
 0x863   :  { %v708_v12 = vpack.c.bf16 %v703_v10, %v702_v9 }
 0x865   :  { %2266 = vmatmul.mubr.msk.bf16.vlgmr.msra.gmra.mrb[16].mxu1 %vm178_vm3, %v708_v12 }
 0x866   :  { %2270 = vmatpush3.bf16.msra.mxu1 %v2465_v11  ;;  %2277 = vmatprep.mubr.msk.bf16.mxu1 %vm2612_vm1, %v2611_v2  ;;  %v2045_v11 = vld [vmem:[%s3313_s8 + $0x1] ss:$0 sm:$0xff]  ;;  %s3318_s8 = smov 64  }
 0x867   :  { %2271 = vmatprep.subr.bf16.mxu1 %v2611_v2 }
 0x86a   :  { %2272 = vmatpush3.bf16.msra.mxu1 %v2466_v14 }
 0x86b   :  { %2273 = vmatprep.subr.bf16.mxu1 %v2611_v2 }
 0x86e   :  { %2274 = vmatpush3.bf16.msra.mxu1 %v2467_v16 }
 0x86f   :  { %2275 = vmatprep.subr.bf16.mxu1 %v2611_v2 }
 0x872   :  { %2276 = vmatpush3.bf16.msra.mxu1 %v2468_v19 }
 0x873   :  { %2281 = vmatprep.subr.bf16.mxu1 %v2611_v2 }
 0x938   :  { %v765_v22 = vpop.f32.mrb[16].mxu1 }
 0x939   :  { %v766_v24 = vadd.f32 %v2028_v20, %v765_v22  ;;  %v2267_v25 = vpop.f32.mrb[17].mxu1 }
 0x93a   :  { %v768_v26 = vpop.f32.mrb[18].mxu1 }
 0x93b   :  { %v769_v27 = vadd.f32 %v2028_v20, %v768_v26  ;;  %v2268_v28 = vpop.f32.mrb[19].mxu1  ;;  %v772_v29 = vmax.f32 %v766_v24, 0.0 }
 0x93d   :  { %v773_v31 = vmax.f32 %v769_v27, 0.0 }
 0x93f   :  { %v782_v33 = vpack.c.bf16 %v773_v31, %v772_v29 }
 0x941   :  { %2278 = vmatmul.mubr.msk.bf16.vlgmr.msra.gmra.mrb[20].mxu1 %vm375_vm5, %v782_v33 }
 0x942   :  { %2285 = vmatprep.mubr.msk.bf16.mxu1 %vm2612_vm1, %v2611_v2  ;;  %2282 = vmatpush3.bf16.msra.mxu1 %v2469_v17 }
 0x943   :  { %2283 = vmatprep.subr.bf16.mxu1 %v2611_v2 }
 0x946   :  { %2284 = vmatpush3.bf16.msra.mxu1 %v2470_v18 }
 0xa14   :  { %v851_v35 = vpop.f32.mrb[20].mxu1 }
 0xa15   :  { %v852_v46 = vadd.f32 %v2032_v34, %v851_v35  ;;  %v2279_v36 = vpop.f32.mrb[21].mxu1 }
 0xa16   :  { %v854_v45 = vpop.f32.mrb[22].mxu1 }
 0xa17   :  { %v855_v37 = vadd.f32 %v2032_v34, %v854_v45  ;;  %v2280_v38 = vpop.f32.mrb[23].mxu1  ;;  %v858_v39 = vadd.f32 %v852_v46, %v702_v9 }
 0xa19   :  { %v862_v40 = vsel %vm178_vm3, %v858_v39, 0.0  ;;  %v859_v41 = vadd.f32 %v855_v37, %v703_v10 }
 0xa1a   :  { %863 = vadd.xlane.f32.xlu0 %v862_v40 }
 0xa1b   :  { %v865_v42 = vsel %vm178_vm3, %v859_v41, 0.0 }
 0xa1c   :  { %866 = vadd.xlane.f32.xlu1 %v865_v42 }
 0xaa7   :  { %v864_v43 = vpop.xlane.xlu0 %863 }
 0xaa8   :  { %v868_v44 = vmul.f32 0.03125, %v864_v43 }
 0xaa9   :  { %v867_v47 = vpop.xlane.xlu1 %866 }
 0xaaa   :  { %v870_v48 = vsub.f32 %v858_v39, %v868_v44  ;;  %v869_v49 = vmul.f32 0.03125, %v867_v47 }
 0xaac   :  { %v871_v50 = vsub.f32 %v859_v41, %v869_v49  ;;  %v872_v51 = vmul.f32 %v870_v48, %v870_v48 }
 0xaae   :  { %v874_v52 = vsel %vm178_vm3, %v872_v51, 0.0  ;;  %v873_v53 = vmul.f32 %v871_v50, %v871_v50 }
 0xaaf   :  { %875 = vadd.xlane.f32.xlu0 %v874_v52 }
 0xab0   :  { %v877_v54 = vsel %vm178_vm3, %v873_v53, 0.0 }
 0xab1   :  { %878 = vadd.xlane.f32.xlu1 %v877_v54 }
 0xb3c   :  { %v876_v55 = vpop.xlane.xlu0 %875 }
 0xb3d   :  { %v880_v56 = vmul.f32 0.03125, %v876_v55 }
 0xb3e   :  { %v879_v30 = vpop.xlane.xlu1 %878 }
 0xb3f   :  { %v882_v57 = vadd.f32 1e-05, %v880_v56  ;;  %v881_v58 = vmul.f32 0.03125, %v879_v30 }
 0xb41   :  { %2537 = vrsqrt.f32 %v882_v57  ;;  %v883_v59 = vadd.f32 1e-05, %v881_v58 }
 0xb43   :  { %2539 = vrsqrt.f32 %v883_v59 }
 0xb4b   :  { %v2538_v60 = vpop.eup %2537 }
 0xb4c   :  { %v886_v62 = vmul.f32 %v2538_v60, %v870_v48 }
 0xb4d   :  { %v2540_v63 = vpop.eup %2539 }
 0xb4e   :  { %v894_v0 = vmul.f32 %v2038_v61, %v886_v62  ;;  %v887_v3 = vmul.f32 %v2540_v63, %v871_v50 }
 0xb50   :  { %v895_v7 = vmul.f32 %v2038_v61, %v887_v3  ;;  %v3003_v8 = vadd.f32 %v2039_v5, %v894_v0 }
 0xb52   :  { %v3005_v9 = vadd.f32 %v2039_v5, %v895_v7 }
 0xb54   :  { %v909_v10 = vpack.c.bf16 %v3005_v9, %v3003_v8 }
 0xb56   :  { %2286 = vmatmul.mubr.msk.bf16.vlgmr.msra.gmra.mrb[24].mxu1 %vm178_vm3, %v909_v10 }
 0xc29   :  { %v967_v12 = vpop.f32.mrb[24].mxu1 }
 0xc2a   :  { %v968_v14 = vadd.f32 %v2045_v11, %v967_v12  ;;  %v2287_v16 = vpop.f32.mrb[25].mxu1 }
 0xc2b   :  { %v970_v19 = vpop.f32.mrb[26].mxu1 }
 0xc2c   :  { %v971_v20 = vadd.f32 %v2045_v11, %v970_v19  ;;  %v2288_v22 = vpop.f32.mrb[27].mxu1  ;;  %v974_v24 = vmul.f32 0.35355338, %v968_v14 }
 0xc2e   :  { %v975_v25 = vmul.f32 0.35355338, %v971_v20  ;;  %v2419_v26 = vpack.i.bf16 %v971_v20, %v968_v14  ;;  %v3013_v27 = vpack.c.bf16 %v971_v20, %v968_v14 }
 0xc30   :  { %2420 = vrot.lane.b32.xlu1 %v2419_v26, %s2615_s9  ;;  %2415 = vrot.lane.b32.xlu0 %v2419_v26, %s2614_s28  ;;  %v996_v28 = vpack.c.bf16 %v975_v25, %v974_v24  ;;  %v2429_v29 = vpack.i.bf16 %v975_v25, %v974_v24 }
 0xc32   :  { %2297 = vmatprep.mubr.msk.bf16.mxu0 %vm285_vm4, %v996_v28 }
 0xc34   :  { %2425 = vrot.lane.b32.xlu1 %v2419_v26, %s2613_s27  ;;  %1028 = vrot.lane.b32.xlu0 %v3013_v27, %s2616_s5 }
 0xca2   :  { %v2421_v31 = vpop.permute.xlu1 %2420  ;;  %v2416_v33 = vpop.permute.xlu0 %2415 }
 0xca3   :  { %v2423_v34 = vunpack.i.h.bf16 %v2421_v31  ;;  %v2422_v35 = vunpack.i.l.bf16 %v2421_v31  ;;  %v2418_v46 = vunpack.i.h.bf16 %v2416_v33  ;;  %v2417_v36 = vunpack.i.l.bf16 %v2416_v33 }
 0xca5   :  { %v3021_v45 = vpack.c.bf16 %v2423_v34, %v2422_v35  ;;  %v3023_v37 = vpack.c.bf16 %v2418_v46, %v2417_v36 }
 0xca6   :  { %v2426_v38 = vpop.permute.xlu1 %2425  ;;  %v1029_v39 = vpop.permute.xlu0 %1028 }
 0xca7   :  { %v2428_v40 = vunpack.i.h.bf16 %v2426_v38  ;;  %v2427_v41 = vunpack.i.l.bf16 %v2426_v38  ;;  %v1049_v42 = vsel %vm285_vm4, %v1029_v39, 0  ;;  %1030 = vrot.lane.b32.xlu1 %v3023_v37, %s2616_s5  ;;  %1032 = vrot.lane.b32.xlu0 %v3021_v45, %s2616_s5 }
 0xca8   :  { %2353 = vmatprep.subr.msk.bf16.mxu0 %vm285_vm4, %v1029_v39 }
 0xca9   :  { %v3031_v43 = vpack.c.bf16 %v2428_v40, %v2427_v41  ;;  %2290 = vmatpush3.bf16.xpose.msra.mxu0 %v1049_v42 }
 0xcab   :  { %1034 = vrot.lane.b32.xlu1 %v3031_v43, %s2616_s5  ;;  %2430 = vrot.lane.b32.xlu0 %v2429_v29, %s2614_s28 }
 0xcaf   :  { %2435 = vrot.lane.b32.xlu1 %v2429_v29, %s2615_s9  ;;  %2440 = vrot.lane.b32.xlu0 %v2429_v29, %s2613_s27 }
 0xd19   :  { %v1031_v44 = vpop.permute.xlu1 %1030  ;;  %v1033_v48 = vpop.permute.xlu0 %1032 }
 0xd1a   :  { %v1052_v47 = vsel %vm285_vm4, %v1031_v44, 0  ;;  %2354 = vmatprep.subr.msk.bf16.mxu0 %vm285_vm4, %v1031_v44  ;;  %v1055_v49 = vsel %vm285_vm4, %v1033_v48, 0 }
 0xd1b   :  { %2292 = vmatpush3.bf16.xpose.msra.mxu0 %v1052_v47 }
 0xd1c   :  { %2355 = vmatprep.subr.msk.bf16.mxu0 %vm285_vm4, %v1033_v48 }
 0xd1d   :  { %v1035_v50 = vpop.permute.xlu1 %1034  ;;  %v2431_v51 = vpop.permute.xlu0 %2430 }
 0xd1e   :  { %v1058_v52 = vsel %vm285_vm4, %v1035_v50, 0  ;;  %v2433_v54 = vunpack.i.h.bf16 %v2431_v51  ;;  %v2432_v17 = vunpack.i.l.bf16 %v2431_v51 }
 0xd20   :  { %v997_v56 = vpack.c.bf16 %v2433_v54, %v2432_v17 }
 0xd21   :  { %v2436_v53 = vpop.permute.xlu1 %2435  ;;  %v2441_v57 = vpop.permute.xlu0 %2440 }
 0xd22   :  { %v2438_v18 = vunpack.i.h.bf16 %v2436_v53  ;;  %v2437_v55 = vunpack.i.l.bf16 %v2436_v53  ;;  %v2443_v58 = vunpack.i.h.bf16 %v2441_v57  ;;  %v2442_v59 = vunpack.i.l.bf16 %v2441_v57 }
 0xd23   :  { %2294 = vmatpush3.bf16.xpose.msra.mxu0 %v1055_v49 }
 0xd24   :  { %2356 = vmatprep.subr.msk.bf16.mxu0 %vm285_vm4, %v1035_v50  ;;  %v998_v30 = vpack.c.bf16 %v2438_v18, %v2437_v55  ;;  %v999_v60 = vpack.c.bf16 %v2443_v58, %v2442_v59 }
 0xd2b   :  { %2296 = vmatpush3.bf16.xpose.msra.mxu0 %v1058_v52 }
 0xd2c   :  { %2337 = vmatprep.subr.bf16.mxu0 %v2611_v2 }
 0xd32   :  { %2298 = vmatmul.mubr.msk.bf16.vlgmr.msra.gmra.mrb[12].mxu0 %vm285_vm4, %v997_v56 }
 0xd33   :  { %2301 = vmatprep.mubr.msk.bf16.mxu0 %vm285_vm4, %v998_v30 }
 0xd3a   :  { %2302 = vmatmul.mubr.msk.bf16.gmra.mrb[16].mxu0 %vm285_vm4, %v999_v60 }
 0xd3b   :  { %2345 = vmatprep.mubr.msk.bf16.mxu0 %vm2612_vm1, %v2611_v2 }
 0xe05   :  { %v2299_v61 = vpop.f32.mrb[12].mxu0 }
 0xe06   :  { %v1094_v62 = vpop.f32.mrb[13].mxu0  ;;  %v1103_v11 = vadd.f32 %v2299_v61, %v2836_v4 }
 0xe07   :  { %v1095_v63 = vadd.f32 %v1094_v62, %v2831_v1  ;;  %v2300_v0 = vpop.f32.mrb[14].mxu0 }
 0xe08   :  { %v1097_v3 = vpop.f32.mrb[15].mxu0  ;;  %v1106_v5 = vadd.f32 %v2300_v0, %v2850_v13  ;;  %v1131_v13 = vsel %vm375_vm5, %v1103_v11, -inf }
 0xe09   :  { %v1098_v7 = vadd.f32 %v1097_v3, %v2841_v6  ;;  %v1125_v10 = vsel %vm375_vm5, %v1095_v63, -inf }
 0xe0a   :  { %1126 = vmax.xlane.f32.xlu1 %v1125_v10  ;;  %v1134_v16 = vsel %vm375_vm5, %v1106_v5, -inf }
 0xe0b   :  { %v1128_v12 = vsel %vm375_vm5, %v1098_v7, -inf }
 0xe0c   :  { %1129 = vmax.xlane.f32.xlu0 %v1128_v12 }
 0xe0d   :  { %v2303_v14 = vpop.f32.mrb[16].mxu0 }
 0xe0e   :  { %v1110_v19 = vpop.f32.mrb[17].mxu0  ;;  %1135 = vmax.xlane.f32.xlu1 %v1134_v16  ;;  %v1119_v24 = vadd.f32 %v2303_v14, %v2863_v21 }
 0xe0f   :  { %v1111_v1 = vadd.f32 %v1110_v19, %v2856_v15  ;;  %v2304_v20 = vpop.f32.mrb[18].mxu0 }
 0xe10   :  { %v1113_v22 = vpop.f32.mrb[19].mxu0  ;;  %1132 = vmax.xlane.f32.xlu0 %v1131_v13  ;;  %v1122_v4 = vadd.f32 %v2304_v20, %v2878_v32  ;;  %v1143_v28 = vsel %vm375_vm5, %v1119_v24, -inf }
 0xe11   :  { %v1114_v6 = vadd.f32 %v1113_v22, %v2868_v23  ;;  %v1137_v25 = vsel %vm375_vm5, %v1111_v1, -inf }
 0xe12   :  { %v1146_v15 = vsel %vm375_vm5, %v1122_v4, -inf }
 0xe13   :  { %v1140_v26 = vsel %vm375_vm5, %v1114_v6, -inf }
 0xe14   :  { %1138 = vmax.xlane.f32.xlu0 %v1137_v25  ;;  %1141 = vmax.xlane.f32.xlu1 %v1140_v26 }
 0xe18   :  { %1144 = vmax.xlane.f32.xlu0 %v1143_v28  ;;  %1147 = vmax.xlane.f32.xlu1 %v1146_v15 }
 0xe29   :  { %1219 = vrot.lane.b32.xlu1 %v3023_v37, %s3318_s8 }
 0xe2e   :  { %1217 = vrot.lane.b32.xlu0 %v3013_v27, %s3318_s8 }
 0xe97   :  { %v1127_v21 = vpop.xlane.xlu1 %1126 }
 0xe98   :  { %v1149_v31 = vsub.f32 %v1095_v63, %v1127_v21 }
 0xe99   :  { %v1130_v23 = vpop.xlane.xlu0 %1129 }
 0xe9a   :  { %v1150_v32 = vsub.f32 %v1098_v7, %v1130_v23  ;;  %v1157_v38 = vmul.f32 1.442695, %v1149_v31 }
 0xe9b   :  { %v1136_v29 = vpop.xlane.xlu1 %1135 }
 0xe9c   :  { %v1152_v33 = vsub.f32 %v1106_v5, %v1136_v29  ;;  %v1159_v34 = vmul.f32 1.442695, %v1150_v32 }
 0xe9d   :  { %v1133_v35 = vpop.xlane.xlu0 %1132 }
 0xe9e   :  { %v1163_v46 = vmul.f32 1.442695, %v1152_v33  ;;  %v1151_v36 = vsub.f32 %v1103_v11, %v1133_v35 }
 0xea0   :  { %2541 = vpow2.f32 %v1163_v46  ;;  %v1161_v39 = vmul.f32 1.442695, %v1151_v36 }
 0xea1   :  { %2543 = vpow2.f32 %v1159_v34  ;;  %v1139_v40 = vpop.xlane.xlu0 %1138  ;;  %v1142_v41 = vpop.xlane.xlu1 %1141 }
 0xea2   :  { %2545 = vpow2.f32 %v1161_v39  ;;  %v1153_v37 = vsub.f32 %v1111_v1, %v1139_v40  ;;  %v1154_v27 = vsub.f32 %v1114_v6, %v1142_v41  ;;  %v2471_v39 = vld [vmem:[%s3315_s6 + $0x10] sm:$0xff]   ;;  %v2472_v40 = vld [vmem:[%s3315_s6 + $0x18] sm:$0xff]  }
 0xea3   :  { %2547 = vpow2.f32 %v1157_v38 }
 0xea4   :  { %v1165_v49 = vmul.f32 1.442695, %v1153_v37  ;;  %v1167_v52 = vmul.f32 1.442695, %v1154_v27 }
 0xea5   :  { %v1145_v42 = vpop.xlane.xlu0 %1144  ;;  %v1148_v44 = vpop.xlane.xlu1 %1147 }
 0xea6   :  { %v1155_v47 = vsub.f32 %v1119_v24, %v1145_v42  ;;  %v1156_v48 = vsub.f32 %v1122_v4, %v1148_v44 }
 0xea8   :  { %v1169_v50 = vmul.f32 1.442695, %v1155_v47  ;;  %v1171_v51 = vmul.f32 1.442695, %v1156_v48 }
 0xea9   :  { %v1218_v53 = vpop.permute.xlu0 %1217  ;;  %v1220_v18 = vpop.permute.xlu1 %1219 }
 0xeaa   :  { %v3070_v54 = vpop.eup %2541  ;;  %2549 = vpow2.f32 %v1169_v50  ;;  %2305 = vmatprep.subr.bf16.mxu1 %v1218_v53 }
 0xeab   :  { %v2544_v17 = vpop.eup %2543  ;;  %2551 = vpow2.f32 %v1171_v51  ;;  %2306 = vmatpush3.bf16.msra.mxu1 %v1218_v53  ;;  %v1182_v55 = vsel %vm375_vm5, %v3070_v54, 0.0 }
 0xeac   :  { %v2546_v56 = vpop.eup %2545  ;;  %2553 = vpow2.f32 %v1165_v49  ;;  %1183 = vadd.xlane.f32.xlu1 %v1182_v55  ;;  %2307 = vmatprep.subr.bf16.mxu1 %v1220_v18  ;;  %v1176_v58 = vsel %vm375_vm5, %v2544_v17, 0.0 }
 0xead   :  { %2555 = vpow2.f32 %v1167_v52  ;;  %v1179_v30 = vsel %vm375_vm5, %v2546_v56, 0.0  ;;  %v2548_v57 = vpop.eup %2547 }
 0xeae   :  { %1180 = vadd.xlane.f32.xlu0 %v1179_v30  ;;  %v1173_v59 = vsel %vm375_vm5, %v2548_v57, 0.0 }
 0xeaf   :  { %2308 = vmatpush3.bf16.msra.mxu1 %v1220_v18 }
 0xeb0   :  { %1177 = vadd.xlane.f32.xlu1 %v1176_v58 }
 0xeb2   :  { %1174 = vadd.xlane.f32.xlu0 %v1173_v59 }
 0xeb4   :  { %v2550_v60 = vpop.eup %2549 }
 0xeb5   :  { %v2552_v61 = vpop.eup %2551  ;;  %v1191_v62 = vsel %vm375_vm5, %v2550_v60, 0.0 }
 0xeb6   :  { %v2554_v63 = vpop.eup %2553  ;;  %1192 = vadd.xlane.f32.xlu0 %v1191_v62  ;;  %v1194_v0 = vsel %vm375_vm5, %v2552_v61, 0.0 }
 0xeb7   :  { %v2556_v3 = vpop.eup %2555  ;;  %1195 = vadd.xlane.f32.xlu1 %v1194_v0  ;;  %v1185_v5 = vsel %vm375_vm5, %v2554_v63, 0.0 }
 0xeb8   :  { %v1188_v7 = vsel %vm375_vm5, %v2556_v3, 0.0 }
 0xeba   :  { %1186 = vadd.xlane.f32.xlu0 %v1185_v5  ;;  %v2062_v5 = vld [vmem:[%s3316_s30 + $0x1] ss:$0 sm:$0xff] }
 0xebb   :  { %1189 = vadd.xlane.f32.xlu1 %v1188_v7 }
 0xecc   :  { %1221 = vrot.lane.b32.xlu1 %v3021_v45, %s3318_s8 }
 0xed0   :  { %1223 = vrot.lane.b32.xlu0 %v3031_v43, %s3318_s8 }
 0xf39   :  { %v1184_v10 = vpop.xlane.xlu1 %1183 }
 0xf3b   :  { %v1181_v11 = vpop.xlane.xlu0 %1180 }
 0xf3d   :  { %v1178_v12 = vpop.xlane.xlu1 %1177 }
 0xf3e   :  { %2557 = vrcp.f32 %v1178_v12 }
 0xf3f   :  { %v1175_v14 = vpop.xlane.xlu0 %1174 }
 0xf40   :  { %2559 = vrcp.f32 %v1175_v14 }
 0xf41   :  { %2561 = vrcp.f32 %v1181_v11 }
 0xf42   :  { %2563 = vrcp.f32 %v1184_v10 }
 0xf43   :  { %v1193_v16 = vpop.xlane.xlu0 %1192 }
 0xf44   :  { %v1196_v19 = vpop.xlane.xlu1 %1195  ;;  %2565 = vrcp.f32 %v1193_v16 }
 0xf47   :  { %v1187_v1 = vpop.xlane.xlu0 %1186 }
 0xf48   :  { %v2558_v20 = vpop.eup %2557  ;;  %2567 = vrcp.f32 %v1187_v1  ;;  %v1190_v13 = vpop.xlane.xlu1 %1189 }
 0xf49   :  { %2569 = vrcp.f32 %v1190_v13  ;;  %v1206_v43 = vmul.f32 %v2558_v20, %v2544_v17 }
 0xf4a   :  { %v2560_v45 = vpop.eup %2559  ;;  %2571 = vrcp.f32 %v1196_v19 }
 0xf4b   :  { %v1205_v22 = vmul.f32 %v2560_v45, %v2548_v57  ;;  %v2562_v6 = vpop.eup %2561  ;;  %v1224_v26 = vpop.permute.xlu0 %1223 }
 0xf4c   :  { %v1222_v24 = vpop.permute.xlu1 %1221  ;;  %v2564_v25 = vpop.eup %2563  ;;  %v1207_v28 = vmul.f32 %v2562_v6, %v2546_v56 }
 0xf4d   :  { %2309 = vmatprep.subr.bf16.mxu1 %v1222_v24  ;;  %v1213_v4 = vpack.c.bf16 %v1206_v43, %v1205_v22  ;;  %v1208_v21 = vmul.f32 %v2564_v25, %v3070_v54 }
 0xf4e   :  { %2310 = vmatpush3.bf16.msra.mxu1 %v1222_v24  ;;  %v2566_v15 = vpop.eup %2565 }
 0xf4f   :  { %2311 = vmatprep.subr.bf16.mxu1 %v1224_v26  ;;  %2313 = vmatprep.mubr.msk.bf16.mxu1 %vm375_vm5, %v1213_v4  ;;  %v1214_v29 = vpack.c.bf16 %v1208_v21, %v1207_v28  ;;  %v1211_v46 = vmul.f32 %v2566_v15, %v2550_v60  ;;  %v2474_v15 = vld [vmem:[%s3317_s29 + $0x18] sm:$0xff]   ;;  %v2475_v21 = vld [vmem:[%s3270_s11 + $0x20] sm:$0xff]  }
 0xf50   :  { %2338 = vmatpush3.bf16.msra.mxu0 %v2475_v21 }
 0xf51   :  { %2339 = vmatprep.subr.bf16.mxu0 %v2611_v2 }
 0xf52   :  { %v2568_v23 = vpop.eup %2567  ;;  %2312 = vmatpush3.bf16.msra.mxu1 %v1224_v26 }
 0xf53   :  { %v2570_v32 = vpop.eup %2569  ;;  %v1209_v31 = vmul.f32 %v2568_v23, %v2554_v63  ;;  %2321 = vmatprep.subr.bf16.mxu1 %v2611_v2  ;;  %v2476_v23 = vld [vmem:[%s3270_s11 + $0x28] sm:$0xff]  }
 0xf54   :  { %v2572_v33 = vpop.eup %2571  ;;  %v1210_v34 = vmul.f32 %v2570_v32, %v2556_v3  ;;  %2340 = vmatpush3.bf16.msra.mxu0 %v2476_v23 }
 0xf55   :  { %2314 = vmatmul.mubr.msk.bf16.vlgmr.msra.gmra.mrb[28].mxu1 %vm375_vm5, %v1214_v29  ;;  %v1212_v36 = vmul.f32 %v2572_v33, %v2552_v61  ;;  %2341 = vmatprep.subr.bf16.mxu0 %v2611_v2 }
 0xf56   :  { %v1215_v35 = vpack.c.bf16 %v1210_v34, %v1209_v31  ;;  %2322 = vmatpush3.bf16.msra.mxu1 %v2471_v39 }
 0xf57   :  { %v1216_v38 = vpack.c.bf16 %v1212_v36, %v1211_v46  ;;  %2323 = vmatprep.subr.bf16.mxu1 %v2611_v2 }
 0xf58   :  { %2317 = vmatprep.mubr.msk.bf16.mxu1 %vm375_vm5, %v1215_v35 }
 0xf5a   :  { %2324 = vmatpush3.bf16.msra.mxu1 %v2472_v40 }
 0xf5b   :  { %2329 = vmatprep.subr.bf16.mxu1 %v2611_v2 }
 0xf5d   :  { %2318 = vmatmul.mubr.msk.bf16.gmra.mrb[32].mxu1 %vm375_vm5, %v1216_v38  ;;  %v2068_v38 = vld [vmem:[%s3272_s13 + $0x1] ss:$0 sm:$0xff] }
 0xf5e   :  { %2325 = vmatprep.mubr.msk.bf16.mxu1 %vm2612_vm1, %v2611_v2 }
0x1028   :  { %v2315_v41 = vpop.f32.mrb[28].mxu1 }
0x1029   :  { %v1275_v37 = vpop.f32.mrb[29].mxu1 }
0x102a   :  { %v2316_v27 = vpop.f32.mrb[30].mxu1 }
0x102b   :  { %v2444_v42 = vpack.i.bf16 %v2316_v27, %v2315_v41  ;;  %v1278_v44 = vpop.f32.mrb[31].mxu1 }
0x102d   :  { %2445 = vrot.lane.b32.xlu1 %v2444_v42, %s3319_s2 }
0x1030   :  { %v2319_v47 = vpop.f32.mrb[32].mxu1 }
0x1031   :  { %v1291_v48 = vpop.f32.mrb[33].mxu1 }
0x1032   :  { %v2320_v49 = vpop.f32.mrb[34].mxu1 }
0x1033   :  { %v2454_v50 = vpack.i.bf16 %v2320_v49, %v2319_v47  ;;  %v1294_v51 = vpop.f32.mrb[35].mxu1  ;;  %v2478_v49 = vld [vmem:[%s3270_s11 + $0x38] sm:$0xff]  }
0x1034   :  { %v2449_v52 = vpack.i.bf16 %v1294_v51, %v1291_v48  ;;  %v2477_v48 = vld [vmem:[%s3270_s11 + $0x30] sm:$0xff]  }
0x1035   :  { %2455 = vrot.lane.b32.xlu1 %v2454_v50, %s3320_s26  ;;  %2342 = vmatpush3.bf16.msra.mxu0 %v2477_v48  ;;  %v2075_v50 = vld [vmem:[%s3269_s10 + $0x1] ss:$0 sm:$0xff] }
0x1036   :  { %2450 = vrot.lane.b32.xlu0 %v2449_v52, %s3321_s1  ;;  %2343 = vmatprep.subr.bf16.mxu0 %v2611_v2  ;;  %v2486_v48 = vld [vmem:[%s3282_s23] sm:$0xff]  }
0x1039   :  { %2344 = vmatpush3.bf16.msra.mxu0 %v2478_v49  ;;  %v2487_v49 = vld [vmem:[%s3282_s23 + $0x48] sm:$0xff]  }
0x109f   :  { %v2446_v53 = vpop.permute.xlu1 %2445 }
0x10a0   :  { %v2448_v54 = vunpack.i.h.bf16 %v2446_v53  ;;  %v2447_v17 = vunpack.i.l.bf16 %v2446_v53 }
0x10a2   :  { %v1330_v57 = vsel %vm285_vm4, %v1275_v37, %v2447_v17  ;;  %v1331_v58 = vsel %vm285_vm4, %v1278_v44, %v2448_v54  ;;  %v2069_v37 = vld [vmem:[%s3273_s14 + $0x1] ss:$0 sm:$0xff] }
0x10a7   :  { %v2456_v18 = vpop.permute.xlu1 %2455 }
0x10a8   :  { %v2451_v55 = vpop.permute.xlu0 %2450  ;;  %v2458_v59 = vunpack.i.h.bf16 %v2456_v18  ;;  %v2457_v60 = vunpack.i.l.bf16 %v2456_v18 }
0x10a9   :  { %v2453_v56 = vunpack.i.h.bf16 %v2451_v55  ;;  %v2452_v30 = vunpack.i.l.bf16 %v2451_v55 }
0x10ab   :  { %v1333_v61 = vsel %vm583_vm6, %v1331_v58, %v2453_v56  ;;  %v1332_v62 = vsel %vm583_vm6, %v1330_v57, %v2452_v30 }
0x10ac   :  { %v1335_v63 = vsel %vm586_vm7, %v1333_v61, %v2458_v59  ;;  %v1334_v0 = vsel %vm586_vm7, %v1332_v62, %v2457_v60 }
0x10ad   :  { %v1341_v3 = vpack.c.bf16 %v1335_v63, %v1334_v0 }
0x10af   :  { %2326 = vmatmul.mubr.msk.bf16.vlgmr.msra.gmra.mrb[36].mxu1 %vm178_vm3, %v1341_v3 }
0x10b0   :  { %2333 = vmatprep.mubr.msk.bf16.mxu1 %vm2612_vm1, %v2611_v2 }
0x1182   :  { %v1399_v7 = vpop.f32.mrb[36].mxu1 }
0x1183   :  { %v1400_v10 = vadd.f32 %v2062_v5, %v1399_v7  ;;  %v2327_v11 = vpop.f32.mrb[37].mxu1 }
0x1184   :  { %v1402_v12 = vpop.f32.mrb[38].mxu1 }
0x1185   :  { %v1403_v14 = vadd.f32 %v2062_v5, %v1402_v12  ;;  %v2328_v16 = vpop.f32.mrb[39].mxu1  ;;  %v1406_v19 = vadd.f32 %v1400_v10, %v3003_v8 }
0x1187   :  { %v1412_v1 = vsel %vm178_vm3, %v1406_v19, 0.0  ;;  %v1407_v20 = vadd.f32 %v1403_v14, %v3005_v9  ;;  %v2473_v9 = vld [vmem:[%s3317_s29 + $0x10] sm:$0xff]  }
0x1188   :  { %1413 = vadd.xlane.f32.xlu0 %v1412_v1  ;;  %2330 = vmatpush3.bf16.msra.mxu1 %v2473_v9  ;;  %v2097_v9 = vld [vmem:[%s3275_s16 + $0x1] ss:$0 sm:$0xff] }
0x1189   :  { %v1415_v13 = vsel %vm178_vm3, %v1407_v20, 0.0  ;;  %2331 = vmatprep.subr.bf16.mxu1 %v2611_v2  ;;  %v2088_v2 = vld [vmem:[%s3271_s12 + $0x1] ss:$0 sm:$0xff] }
0x118a   :  { %1416 = vadd.xlane.f32.xlu1 %v1415_v13 }
0x118c   :  { %2332 = vmatpush3.bf16.msra.mxu1 %v2474_v15 }
0x1215   :  { %v1414_v45 = vpop.xlane.xlu0 %1413 }
0x1216   :  { %v1418_v22 = vmul.f32 0.03125, %v1414_v45 }
0x1217   :  { %v1417_v43 = vpop.xlane.xlu1 %1416 }
0x1218   :  { %v1420_v6 = vsub.f32 %v1406_v19, %v1418_v22  ;;  %v1419_v24 = vmul.f32 0.03125, %v1417_v43 }
0x121a   :  { %v1421_v4 = vsub.f32 %v1407_v20, %v1419_v24  ;;  %v1422_v25 = vmul.f32 %v1420_v6, %v1420_v6 }
0x121c   :  { %v1424_v26 = vsel %vm178_vm3, %v1422_v25, 0.0  ;;  %v1423_v28 = vmul.f32 %v1421_v4, %v1421_v4 }
0x121d   :  { %1425 = vadd.xlane.f32.xlu0 %v1424_v26  ;;  %v2096_v26 = vld [vmem:[%s3274_s15 + $0x1] ss:$0 sm:$0xff] }
0x121e   :  { %v1427_v8 = vsel %vm178_vm3, %v1423_v28, 0.0 }
0x1221   :  { %1428 = vadd.xlane.f32.xlu0 %v1427_v8 }
0x12aa   :  { %v1426_v32 = vpop.xlane.xlu0 %1425 }
0x12ab   :  { %v1430_v29 = vmul.f32 0.03125, %v1426_v32 }
0x12ad   :  { %v1432_v31 = vadd.f32 1e-05, %v1430_v29 }
0x12ae   :  { %v1429_v33 = vpop.xlane.xlu0 %1428 }
0x12af   :  { %2573 = vrsqrt.f32 %v1432_v31  ;;  %v1431_v34 = vmul.f32 0.03125, %v1429_v33 }
0x12b1   :  { %v1433_v35 = vadd.f32 1e-05, %v1431_v34 }
0x12b3   :  { %2575 = vrsqrt.f32 %v1433_v35 }
0x12b9   :  { %v2574_v46 = vpop.eup %2573 }
0x12ba   :  { %v1436_v36 = vmul.f32 %v2574_v46, %v1420_v6 }
0x12bc   :  { %v1444_v40 = vmul.f32 %v2068_v38, %v1436_v36 }
0x12bd   :  { %v2576_v39 = vpop.eup %2575 }
0x12be   :  { %v1437_v41 = vmul.f32 %v2576_v39, %v1421_v4  ;;  %v1452_v42 = vadd.f32 %v2069_v37, %v1444_v40 }
0x12c0   :  { %v1445_v27 = vmul.f32 %v2068_v38, %v1437_v41  ;;  %v2481_v41 = vld [vmem:[%s3278_s19 + $0x4] ss:$8 sps:$4 sm:$0xff]  }
0x12c1   :  { %1738 = vmatprep.subr.bf16.mxu1 %v2481_v41 }
0x12c2   :  { %v1453_v44 = vadd.f32 %v2069_v37, %v1445_v27  ;;  %v2479_v37 = vld [vmem:[%s3278_s19] ss:$8 sps:$4 sm:$0xff]   ;;  %v2482_v27 = vld [vmem:[%s3278_s19 + $0x10] ss:$8 sps:$4 sm:$0xff]  }
0x12c4   :  { %v1459_v47 = vpack.c.bf16 %v1453_v44, %v1452_v42 }
0x12c6   :  { %2334 = vmatmul.mubr.msk.bf16.vlgmr.msra.gmra.mrb[40].mxu1 %vm178_vm3, %v1459_v47  ;;  %v2485_v47 = vld [vmem:[%s3282_s23 + $0x40] sm:$0xff]  }
0x12c7   :  { %1739 = vmatpush1.bf16.msra.mxu1 %v2479_v37  ;;  %2185 = vmatprep.subr.bf16.mxu0 %v2485_v47 }
0x1399   :  { %v1517_v51 = vpop.f32.mrb[40].mxu1 }
0x139a   :  { %v1518_v52 = vadd.f32 %v2075_v50, %v1517_v51  ;;  %v2335_v53 = vpop.f32.mrb[41].mxu1  ;;  %v2489_v51 = vld [vmem:[%s3282_s23 + $0x50] sm:$0xff]  }
0x139b   :  { %v1520_v54 = vpop.f32.mrb[42].mxu1  ;;  %v2491_v53 = vld [vmem:[%s3282_s23 + $0x58] sm:$0xff]  }
0x139c   :  { %v1521_v17 = vadd.f32 %v2075_v50, %v1520_v54  ;;  %v2336_v18 = vpop.f32.mrb[43].mxu1  ;;  %v1524_v55 = vmax.f32 %v1518_v52, 0.0  ;;  %v2488_v50 = vld [vmem:[%s3282_s23 + $0x8] sm:$0xff]   ;;  %v2490_v52 = vld [vmem:[%s3282_s23 + $0x10] sm:$0xff]   ;;  %v2492_v54 = vld [vmem:[%s3282_s23 + $0x18] sm:$0xff]  }
0x139d   :  { %v2494_v18 = vld [vmem:[%s3282_s23 + $0x20] sm:$0xff]  }
0x139e   :  { %v1525_v56 = vmax.f32 %v1521_v17, 0.0  ;;  %v2493_v17 = vld [vmem:[%s3282_s23 + $0x60] sm:$0xff]  }
0x13a0   :  { %v1535_v30 = vpack.c.bf16 %v1525_v56, %v1524_v55 }
0x13a2   :  { %2346 = vmatmul.mubr.msk.bf16.vlgmr.msra.gmra.mrb[20].mxu0 %vm375_vm5, %v1535_v30 }
0x13a3   :  { %2186 = vmatpush3.bf16.msra.mxu0 %v2486_v48 }
0x13a4   :  { %2187 = vmatprep.subr.bf16.mxu0 %v2487_v49 }
0x13a7   :  { %2188 = vmatpush3.bf16.msra.mxu0 %v2488_v50 }
0x13a8   :  { %2189 = vmatprep.subr.bf16.mxu0 %v2489_v51 }
0x13ab   :  { %2190 = vmatpush3.bf16.msra.mxu0 %v2490_v52 }
0x13ac   :  { %2191 = vmatprep.subr.bf16.mxu0 %v2491_v53 }
0x13af   :  { %2192 = vmatpush3.bf16.msra.mxu0 %v2492_v54 }
0x13b0   :  { %2193 = vmatprep.subr.bf16.mxu0 %v2493_v17 }
0x13b3   :  { %2194 = vmatpush3.bf16.msra.mxu0 %v2494_v18 }
0x1475   :  { %v1605_v57 = vpop.f32.mrb[20].mxu0 }
0x1476   :  { %v1606_v58 = vadd.f32 %v2088_v2, %v1605_v57  ;;  %v2347_v59 = vpop.f32.mrb[21].mxu0  ;;  %v2098_v57 = vld [vmem:[%s3276_s17] ss:$0 sm:$0xff] }
0x1477   :  { %v1608_v60 = vpop.f32.mrb[22].mxu0  ;;  %v2099_v59 = vld [vmem:[%s3277_s18] ss:$0 sm:$0xff] }
0x1478   :  { %v1609_v61 = vadd.f32 %v2088_v2, %v1608_v60  ;;  %v2348_v62 = vpop.f32.mrb[23].mxu0  ;;  %v1612_v63 = vadd.f32 %v1606_v58, %v1452_v42  ;;  %v2484_v42 = vld [vmem:[%s3278_s19 + $0x14] ss:$8 sps:$4 sm:$0xff]  }
0x1479   :  { %1740 = vmatprep.subr.bf16.mxu1 %v2484_v42 }
0x147a   :  { %v1618_v0 = vsel %vm178_vm3, %v1612_v63, 0.0  ;;  %v1613_v3 = vadd.f32 %v1609_v61, %v1453_v44  ;;  %v2621_v44 = vmov 0   ;;  %1741 = vmatpush1.bf16.msra.mxu1 %v2482_v27 }
0x147b   :  { %1619 = vadd.xlane.f32.xlu1 %v1618_v0  ;;  %1770 = vmatprep.mubr.bf16.mxu1 %v2621_v44  ;;  %v2496_v0 = vld [vmem:[%s3282_s23 + $0x28] sm:$0xff]  }
0x147c   :  { %v1621_v5 = vsel %vm178_vm3, %v1613_v3, 0.0 }
0x147d   :  { %1622 = vadd.xlane.f32.xlu0 %v1621_v5  ;;  %v2498_v5 = vld [vmem:[%s3282_s23 + $0x30] sm:$0xff]  }
0x1508   :  { %v1620_v7 = vpop.xlane.xlu1 %1619 }
0x1509   :  { %v1624_v10 = vmul.f32 0.03125, %v1620_v7  ;;  %v2499_v7 = vld [vmem:[%s3282_s23 + $0x78] sm:$0xff]  }
0x150a   :  { %v1623_v11 = vpop.xlane.xlu0 %1622 }
0x150b   :  { %v1626_v12 = vsub.f32 %v1612_v63, %v1624_v10  ;;  %v1625_v14 = vmul.f32 0.03125, %v1623_v11  ;;  %v2495_v63 = vld [vmem:[%s3282_s23 + $0x68] sm:$0xff]   ;;  %v2500_v10 = vld [vmem:[%s3282_s23 + $0x38] sm:$0xff]   ;;  %v1705_v11 = vlaneseq }
0x150c   :  { %2195 = vmatprep.subr.bf16.mxu0 %v2495_v63 }
0x150d   :  { %v1627_v16 = vsub.f32 %v1613_v3, %v1625_v14  ;;  %v1628_v19 = vmul.f32 %v1626_v12, %v1626_v12  ;;  %2196 = vmatpush3.bf16.msra.mxu0 %v2496_v0  ;;  %v2497_v3 = vld [vmem:[%s3282_s23 + $0x70] sm:$0xff]  }
0x150e   :  { %2197 = vmatprep.subr.bf16.mxu0 %v2497_v3 }
0x150f   :  { %v1630_v1 = vsel %vm178_vm3, %v1628_v19, 0.0  ;;  %v1629_v20 = vmul.f32 %v1627_v16, %v1627_v16 }
0x1510   :  { %1631 = vadd.xlane.f32.xlu1 %v1630_v1 }
0x1511   :  { %v1633_v13 = vsel %vm178_vm3, %v1629_v20, 0.0  ;;  %2198 = vmatpush3.bf16.msra.mxu0 %v2498_v5  ;;  %v1781_v20 = vld [vmem:[%s3280_s21] sm:$0x3] }
0x1512   :  { %1634 = vadd.xlane.f32.xlu0 %v1633_v13  ;;  %2199 = vmatprep.subr.bf16.mxu0 %v2499_v7 }
0x1515   :  { %2200 = vmatpush3.bf16.msra.mxu0 %v2500_v10 }
0x159d   :  { %v1632_v45 = vpop.xlane.xlu1 %1631 }
0x159e   :  { %v1636_v22 = vmul.f32 0.03125, %v1632_v45 }
0x159f   :  { %v1635_v43 = vpop.xlane.xlu0 %1634 }
0x15a0   :  { %v1638_v6 = vadd.f32 1e-05, %v1636_v22  ;;  %v1637_v24 = vmul.f32 0.03125, %v1635_v43  ;;  %v1795_v22 = vld [vmem:[%s3281_s22] sm:$0x3]  ;;  %s2622_s22 = smov [#allocation2]  }
0x15a1   :  { %s2000_s23 = sshll.u32 %s2622_s22, 4  ;;  %s2001_s23 = int_to_ptr.vmem [resolvable:$true] %s2000_s23 }
0x15a2   :  { %2577 = vrsqrt.f32 %v1638_v6  ;;  %v1639_v4 = vadd.f32 1e-05, %v1637_v24  ;;  %s2587_s8 = scalar_lea.vmem %s2001_s23, 32  ;;  %p2592_p1 = scmp.lt.s32.totalorder %s2001_s23, %s2001_s23 }
0x15a3   :  { %p2588_p0 = scmp.ne.s32.totalorder %s2001_s23, %s2587_s8  ;;  %p2593_p2 = scmp.lt.s32.totalorder %s2587_s8, %s2587_s8 }
0x15a4   :  { %2579 = vrsqrt.f32 %v1639_v4 }
0x15a5   :  { %p2594_p3 = por %p2593_p2, %p2592_p1 }
0x15a7   :  { %p2595_p4 = pnand %p2594_p3, %p2588_p0 }
0x15ac   :  { %v2578_v25 = vpop.eup %2577 }
0x15ad   :  { %v1642_v28 = vmul.f32 %v2578_v25, %v1626_v12  ;;  %v1706_v12 = vshrl.u32 %v1705_v11, 7 }
0x15ae   :  { %v2580_v8 = vpop.eup %2579 }
0x15af   :  { %v1643_v15 = vmul.f32 %v2580_v8, %v1627_v16  ;;  %v1650_v21 = vmul.f32 %v2096_v26, %v1642_v28  ;;  %v1707_v14 = vsub.s32 0, %v1706_v12  ;;  %v1703_v16 = vld [vmem:[%s3279_s20] sm:$0x3]  ;;  %v1711_v19 = vsub.s32 1, %v1706_v12 }
0x15b1   :  { %v1651_v23 = vmul.f32 %v2096_v26, %v1643_v15  ;;  %v1658_v32 = vadd.f32 %v2097_v9, %v1650_v21  ;;  %v1708_v1 = vrot.slane %v1703_v16, %v1707_v14  ;;  %v1712_v13 = vrot.slane %v1703_v16, %v1711_v19 }
0x15b2   :  { %v1786_v6 = vrot.slane %v1781_v20, %v1707_v14  ;;  %v1790_v25 = vrot.slane %v1781_v20, %v1711_v19  ;;  %v1800_v8 = vrot.slane %v1795_v22, %v1707_v14  ;;  %v1804_v21 = vrot.slane %v1795_v22, %v1711_v19 }
0x15b3   :  { %v1659_v29 = vadd.f32 %v2097_v9, %v1651_v23  ;;  %v1661_v31 = vrot.slane %v1658_v32, 7 }
0x15b5   :  { %v1664_v33 = vrot.slane %v1659_v29, 6 }
0x15b7   :  { %v1667_v34 = vsel %vm1666_vm8, %v1661_v31, %v1664_v33 }
0x15b8   :  { %v1671_v35 = vsel %vm1670_vm9, %v1667_v34, 0.0 }
0x15b9   :  { %1672 = vadd.xlane.f32.xlu1 %v1671_v35 }
0x1646   :  { %v1673_v46 = vpop.xlane.xlu1 %1672 }
0x1647   :  { %v1674_v36 = vmul.f32 0.03125, %v1673_v46  ;;  %v2105_v46 = vld [vmem:[%s3283_s24] ss:$0 sm:$0xff] }
0x1649   :  { %v1675_v38 = vsub.f32 %v1667_v34, %v1674_v36 }
0x164b   :  { %v1676_v39 = vmul.f32 %v1675_v38, %v1675_v38 }
0x164d   :  { %v1677_v40 = vsel %vm1670_vm9, %v1676_v39, 0.0 }
0x164e   :  { %1678 = vadd.xlane.f32.xlu0 %v1677_v40 }
0x16db   :  { %v1679_v55 = vpop.xlane.xlu0 %1678 }
0x16dc   :  { %v1680_v56 = vmul.f32 0.03125, %v1679_v55 }
0x16de   :  { %v1681_v30 = vadd.f32 1e-05, %v1680_v56 }
0x16e0   :  { %2581 = vrsqrt.f32 %v1681_v30 }
0x16ea   :  { %v2582_v2 = vpop.eup %2581 }
0x16eb   :  { %v1683_v58 = vmul.f32 %v2582_v2, %v1675_v38 }
0x16ed   :  { %v1690_v60 = vmul.f32 %v2098_v57, %v1683_v58 }
0x16ef   :  { %v1697_v61 = vadd.f32 %v2099_v59, %v1690_v60 }
0x16f1   :  { %v1702_v62 = vpack.c.bf16 %v1697_v61, %v1697_v61 }
0x16f3   :  { %2104 = vmatmul.mubr.msk.bf16.vlgmr.msra.gmra.mrb[44].mxu1 %vm178_vm3, %v1702_v62 }
0x17c6   :  { %v1772_v45 = vpop.f32.mrb[44].mxu1 }
0x17c7   :  { %v1773_v43 = vadd.f32 %v1772_v45, %v1708_v1  ;;  %v1774_v24 = vpop.f32.mrb[45].mxu1 }
0x17c8   :  { %v1775_v4 = vadd.f32 %v1774_v24, %v1712_v13  ;;  %v1776_v26 = vpop.f32.mrb[46].mxu1 }
0x17c9   :  { %v1779_v28 = vmax.f32 %v1773_v43, 0.0  ;;  %v1777_v9 = vpop.f32.mrb[47].mxu1 }
0x17ca   :  { %v1780_v15 = vmax.f32 %v1775_v4, 0.0 }
0x17cb   :  { %v1793_v23 = vmul.f32 %v1786_v6, %v1779_v28 }
0x17cc   :  { %v1794_v32 = vmul.f32 %v1790_v25, %v1780_v15 }
0x17cd   :  { %v1807_v29 = vadd.f32 %v1800_v8, %v1793_v23 }
0x17ce   :  { %v1808_v31 = vadd.f32 %v1804_v21, %v1794_v32 }
0x17cf   :  { %v1841_v34 = vpack.c.bf16 %v1807_v29, %v1807_v29 }
0x17d0   :  { %v1842_v33 = vpack.c.bf16 %v1808_v31, %v1808_v31 }
0x17d2   :  { %1978 = vmatprep.mubr.bf16.mxu0 %v1842_v33 }
0x17d3   :  { %1979 = vmatmul.mubr.bf16.vlgmr.msra.gmra.mrb[24].mxu0 %v1841_v34 }
0x18a6   :  { %v2201_v35 = vpop.f32.mrb[24].mxu0 }
0x18a7   :  { %v2202_v36 = vpop.f32.mrb[25].mxu0 }
0x18a8   :  { %v2203_v38 = vadd.f32 %v2202_v36, %v2201_v35  ;;  %v2204_v39 = vpop.f32.mrb[26].mxu0 }
0x18a9   :  { %v2205_v40 = vpop.f32.mrb[27].mxu0 }
0x18aa   :  { %v1981_v41 = vadd.f32 %v2203_v38, %v2105_v46 }
0x18ac   :  { %v2122_v37 = vmul.f32 -1.442695, %v1981_v41 }
0x18ae   :  { %2583 = vpow2.f32 %v2122_v37 }
0x18b8   :  { %v2584_v27 = vpop.eup %2583 }
0x18b9   :  { %v1989_v42 = vadd.f32 1.0, %v2584_v27 }
0x18bb   :  { %2585 = vrcp.f32 %v1989_v42 }
0x18c5   :  { %v2586_v44 = vpop.eup %2585 }
0x18c6   :  { %1993 = vst.msk [vmem:[#allocation2] sm:$0x3] %vm1992_vm10, %v2586_v44 }
0x18c7   :  { %2598 = shalt.err (!%p2595_p4)
}
0x18c8   :  { %s2599_s28 = scalar_lea.hbm %s3284_s25, 32 }
0x18c9   :  { %p2600_p5 = scmp.ne.s32.totalorder %s3284_s25, %s2599_s28  ;;  %p2603_p6 = scmp.lt.u32.totalorder %s2599_s28, %s3284_s25 }
0x18cb   :  { %p2605_p7 = pnand %p2603_p6, %p2600_p5 }
0x18cd   :  { %2608 = shalt.err (!%p2605_p7)
}
0x18ce   :  { %2003 = dma.vmem_to_hbm [thread:$0]  %s2001_s23, 32, %s3284_s25, [#allocation3]  }
0x18cf   :  { %2609 = dma.done.wait [#allocation3], 32  }
0x18d0   :  { %2610 = vsyncadd [#allocation3], 4294967264 }
0x18d1   :  { %2007 = vsyncpa [#allocation3], 1 }

</bundles_post_ra>
